<compile_context>
chip_gen: v5e
topology: v5e:2x2
jax: 0.10.0
libtpu: 0.0.40
codegen_flags: <defaults>
</compile_context>

<pallas_src>
import functools

import numpy as np
import jax
import jax.numpy as jnp
from jax.experimental import pallas as pl
from jax.experimental.pallas import tpu as pltpu

# ---------------- config (mirrors MetaLearner(config)) ----------------
CONFIG = {
    "userl1": [(0, 8, 8), (8, 16, 8)],  # (op, ed, out): Linear(ed-op -> out, bias=False)
    "userl2": [16],                     # in_features of linear2 (== sum of outs above)
    "cluster_d": 16,
    "clusternum": [0, 2, 2, 1],
}
USER_LEN = 16
ITEM_LEN = 8
HIDDEN = 32
IN_DIM = ITEM_LEN + USER_LEN            # 24
SPT = 8
QRY = 8
UPDATE_LR = 0.001
INNER_STEPS = 3
CLUSTER_D = CONFIG["cluster_d"]
CLUSTER_CS = tuple(CONFIG["clusternum"][1:4])       # (2, 2, 1)

# TODO(synk): BaseLearner / loss_func are not defined in the source module; a
# minimal 2-layer MLP (concat(item, user_pf) -> HIDDEN -> scalar) with MSE loss
# is synthesized so the MAML inner/outer loop has concrete semantics.
VAR_SHAPES = [(IN_DIM, HIDDEN), (HIDDEN,), (1, HIDDEN), (1,)]   # W1, b1, W2, b2
VAR_SIZES = [int(np.prod(s)) for s in VAR_SHAPES]               # [768, 32, 32, 1]
VAR_OFFS = np.cumsum([0] + VAR_SIZES).tolist()                  # [0, 768, 800, 832, 833]
P_TOTAL = VAR_OFFS[-1]                                          # 833
P_PAD = ((P_TOTAL + 127) // 128) * 128                          # 896 (lane-dense output)

_VMEM = pl.BlockSpec(memory_space=pltpu.MemorySpace.VMEM)       # whole array in VMEM


# ====================== kernel 1: task_emb + cluster + adapt ======================
def _embed_cluster_adapt_kernel(u_ref, w1_ref, w2_ref,
                                c1_ref, wc1_ref, bc1_ref,
                                c2_ref, wc2_ref, bc2_ref,
                                c3_ref, wc3_ref, bc3_ref,
                                wae_ref, wac_ref, bada_ref, vflat_ref,
                                out_ref, *, cs, d):
    # gen_task_emb: the per-segment bias-free linears are folded into one
    # block-diagonal matrix (built at init), followed by linear2.
    temb = jnp.dot(jnp.dot(u_ref[...], w1_ref[...], preferred_element_type=jnp.float32),
                   w2_ref[...], preferred_element_type=jnp.float32)          # [1, D]

    def cluster_layer(prev, centers, wcat, bcat, C):
        # softmax_c(-||center_c - prev||_2) @ tanh(Linear_c(prev))
        diff = centers - prev                                                # [C, D]
        # +1e-12 guards the sqrt-at-zero gradient concern flagged in review
        nd = -jnp.sqrt(jnp.sum(diff * diff, axis=1, keepdims=True) + 1e-12)  # [C, 1]
        m = jnp.max(nd, axis=0, keepdims=True)
        e = jnp.exp(nd - m)
        sm = e / jnp.sum(e, axis=0, keepdims=True)                           # [C, 1]
        lin = jnp.dot(prev, wcat, preferred_element_type=jnp.float32) + bcat # [1, C*D]
        t = jnp.tanh(lin)                                                    # one EUP sweep
        acc = sm[0:1, 0:1] * t[:, 0:d]
        for c in range(1, C):            # C <= 2, static
            acc = acc + sm[c:c + 1, 0:1] * t[:, c * d:(c + 1) * d]
        return acc                                                           # [1, D]

    p = cluster_layer(temb, c1_ref[...], wc1_ref[...], bc1_ref[...], cs[0])
    p = cluster_layer(p,    c2_ref[...], wc2_ref[...], bc2_ref[...], cs[1])
    clustered = cluster_layer(p, c3_ref[...], wc3_ref[...], bc3_ref[...], cs[2])

    # adapt: sigmoid(adapt_linear([task_emb, clustered])) * flat(net.vars).
    # cated @ Wada is split into the task_emb / clustered halves (avoids an
    # in-kernel lane concat); all four per-var adapt linears are fused
    # column-wise into one lane-dense [1, P_PAD] matvec.
    gate = (jnp.dot(temb, wae_ref[...], preferred_element_type=jnp.float32)
            + jnp.dot(clustered, wac_ref[...], preferred_element_type=jnp.float32)
            + bada_ref[...])
    out_ref[...] = jax.nn.sigmoid(gate) * vflat_ref[...]                     # [1, P_PAD]


def _embed_adapt_call(params, u_row, vflat):
    (c1, wc1, bc1), (c2, wc2, bc2), (c3, wc3, bc3) = params["cluster"]
    kernel = functools.partial(_embed_cluster_adapt_kernel, cs=CLUSTER_CS, d=CLUSTER_D)
    return pl.pallas_call(
        kernel,
        out_shape=jax.ShapeDtypeStruct((1, P_PAD), jnp.float32),
        in_specs=[_VMEM] * 16,
        out_specs=_VMEM,
    )(u_row, params["w1_blk"], params["w2_t"],
      c1, wc1, bc1, c2, wc2, bc2, c3, wc3, bc3,
      params["wada_e"], params["wada_c"], params["bada"], vflat)


# ====================== kernel 2: 3-step inner SGD + query eval ======================
def _inner_sgd_query_kernel(xs_ref, xst_ref, ys_ref, xq_ref, yq_ref, ucol_ref,
                            ax_ref, au_ref, b1_ref, w2_ref, b2_ref,
                            pred_ref, loss_ref):
    xs, xst, ys = xs_ref[...], xst_ref[...], ys_ref[...]
    ucol = ucol_ref[...]                                    # [USER_LEN, 1]
    ax, au = ax_ref[...], au_ref[...]                       # [ITEM_LEN, H], [USER_LEN, H]
    b1, w2, b2 = b1_ref[...], w2_ref[...], b2_ref[...]      # [1, H], [1, H], [1, 1]
    n = xs.shape[0]

    def mlp(x, ax, au, b1, w2, b2):
        # h = [x, user_pf]: the user half is a rank-1 broadcast contribution,
        # done on the VPU instead of an M=1 MXU matvec; the output layer is a
        # broadcast-multiply + lane reduce instead of an N=1 MXU matvec.
        ucontrib = jnp.sum(ucol * au, axis=0, keepdims=True)                 # [1, H]
        z1 = jnp.dot(x, ax, preferred_element_type=jnp.float32) + ucontrib + b1
        a1 = jnp.maximum(z1, 0.0)
        out = jnp.sum(a1 * w2, axis=1, keepdims=True) + b2                   # [n, 1]
        return z1, a1, out

    # 3 inner SGD steps with analytic gradients of MLP + MSE (fast weights stay
    # resident across steps; loop is static -> fully unrolled for the scheduler).
    for _ in range(INNER_STEPS):
        z1, a1, out = mlp(xs, ax, au, b1, w2, b2)
        g_out = (2.0 / n) * (out - ys)                                       # [n, 1]
        gb2 = jnp.sum(g_out, axis=0, keepdims=True)                          # [1, 1]
        gw2 = jnp.sum(g_out * a1, axis=0, keepdims=True)                     # [1, H]
        gz1 = jnp.where(z1 > 0.0, g_out * w2, 0.0)                           # [n, H]
        gb1 = jnp.sum(gz1, axis=0, keepdims=True)                            # [1, H]
        gax = jnp.dot(xst, gz1, preferred_element_type=jnp.float32)          # [I, H]
        gau = ucol * gb1                                                     # [U, H] outer prod
        ax = ax - UPDATE_LR * gax
        au = au - UPDATE_LR * gau
        b1 = b1 - UPDATE_LR * gb1
        w2 = w2 - UPDATE_LR * gw2
        b2 = b2 - UPDATE_LR * gb2

    # outer evaluation on the query set
    _, _, outq = mlp(xq_ref[...], ax, au, b1, w2, b2)
    dq = outq - yq_ref[...]
    pred_ref[...] = outq
    loss_ref[...] = jnp.sum(dq * dq, axis=0, keepdims=True) / yq_ref.shape[0]


def _inner_query_call(x_spt, y_spt, x_qry, y_qry, u_col, axa, aua, b1a, w2a, b2a):
    return pl.pallas_call(
        _inner_sgd_query_kernel,
        out_shape=(jax.ShapeDtypeStruct((QRY, 1), jnp.float32),
                   jax.ShapeDtypeStruct((1, 1), jnp.float32)),
        in_specs=[_VMEM] * 11,
        out_specs=[_VMEM, _VMEM],
    )(x_spt, x_spt.T, y_spt[:, None], x_qry, y_qry[:, None], u_col,
      axa, aua, b1a, w2a, b2a)


# ====================== parameters ======================
def init_params(key):
    D = CONFIG["cluster_d"]
    keys = iter(jax.random.split(key, 32))

    # linears1 (bias=False) folded into a block-diagonal [USER_LEN, sum(out)] matrix
    cat_out = sum(o for _, _, o in CONFIG["userl1"])
    w1_blk = jnp.zeros((USER_LEN, cat_out), jnp.float32)
    off = 0
    for (op, ed, out) in CONFIG["userl1"]:
        w = 0.1 * jax.random.normal(next(keys), (out, ed - op), jnp.float32)
        w1_blk = w1_blk.at[op:ed, off:off + out].set(w.T)
        off += out

    # linear2 (bias=False): weight [D, userl2[0]], stored pre-transposed
    w2 = 0.1 * jax.random.normal(next(keys), (D, CONFIG["userl2"][0]), jnp.float32)
    w2_t = w2.T

    # cluster layers 1..3: centers [C, D], per-center Linear(D->D) (w, b),
    # concatenated column-wise so one [1, C*D] matvec covers all centers.
    cluster = []
    for layer in range(1, 4):
        C = CONFIG["clusternum"][layer]
        centers = jax.random.normal(next(keys), (C, D), jnp.float32)
        ws = 0.1 * jax.random.normal(next(keys), (C, D, D), jnp.float32)
        bs = 0.1 * jax.random.normal(next(keys), (C, D), jnp.float32)
        wcat = jnp.concatenate([ws[c].T for c in range(C)], axis=1)     # [D, C*D]
        bcat = bs.reshape(1, C * D)                                     # [1, C*D]
        cluster.append((centers, wcat, bcat))

    # BaseLearner vars (synthesized): W1 [IN_DIM, HIDDEN], b1, W2 [1, HIDDEN], b2
    W1 = 0.1 * jax.random.normal(next(keys), (IN_DIM, HIDDEN), jnp.float32)
    b1 = jnp.zeros((HIDDEN,), jnp.float32)
    W2 = 0.1 * jax.random.normal(next(keys), (1, HIDDEN), jnp.float32)
    b2 = jnp.zeros((1,), jnp.float32)
    net_vars = [W1, b1, W2, b2]

    # adapt linears: one Linear(2D -> prod(var.shape)) per var, fused column-wise
    # into a single [2D, P_PAD] matrix (zero-padded to a multiple of 128 lanes).
    w_cols, b_cols = [], []
    for var in net_vars:
        P = int(np.prod(var.shape))
        w = 0.1 * jax.random.normal(next(keys), (P, 2 * D), jnp.float32)
        b = 0.1 * jax.random.normal(next(keys), (P,), jnp.float32)
        w_cols.append(w.T)
        b_cols.append(b)
    wada = jnp.pad(jnp.concatenate(w_cols, axis=1), ((0, 0), (0, P_PAD - P_TOTAL)))
    bada = jnp.pad(jnp.concatenate(b_cols), (0, P_PAD - P_TOTAL))[None, :]

    return {
        "w1_blk": w1_blk,
        "w2_t": w2_t,
        "cluster": cluster,
        "net_vars": net_vars,
        "wada_e": wada[:D, :],      # rows multiplying task_emb
        "wada_c": wada[D:, :],      # rows multiplying clustered
        "bada": bada,
    }


# ====================== MetaLearner.forward ======================
def meta_forward(params, x_spt, y_spt, x_qry, y_qry, user_pf):
    u_row = user_pf[None, :]                                 # [1, USER_LEN]
    u_col = user_pf[:, None]                                 # [USER_LEN, 1]

    # flatten net.vars row-major and pad to the lane-dense width
    W1, b1v, W2, b2v = params["net_vars"]
    vflat = jnp.concatenate([W1.reshape(-1), b1v.reshape(-1),
                             W2.reshape(-1), b2v.reshape(-1)])
    vflat = jnp.pad(vflat, (0, P_PAD - P_TOTAL))[None, :]    # [1, P_PAD]

    # fused kernel 1: gen_task_emb + cluster(3 layers) + adapt gating
    aflat = _embed_adapt_call(params, u_row, vflat)          # [1, P_PAD]

    # unpack adapted weights (tiny host-side slices/reshapes, once per forward)
    W1a = aflat[0, VAR_OFFS[0]:VAR_OFFS[1]].reshape(IN_DIM, HIDDEN)
    axa = W1a[:ITEM_LEN, :]                                  # item-feature rows
    aua = W1a[ITEM_LEN:, :]                                  # user-profile rows
    b1a = aflat[:, VAR_OFFS[1]:VAR_OFFS[2]]                  # [1, HIDDEN]
    w2a = aflat[:, VAR_OFFS[2]:VAR_OFFS[3]]                  # [1, HIDDEN]
    b2a = aflat[:, VAR_OFFS[3]:VAR_OFFS[4]]                  # [1, 1]

    # fused kernel 2: 3-step MAML inner loop (analytic grads) + query evaluation
    pred, loss = _inner_query_call(x_spt, y_spt, x_qry, y_qry, u_col,
                                   axa, aua, b1a, w2a, b2a)
    return pred[:, 0], loss[0, 0]


if __name__ == "__main__":
    key = jax.random.PRNGKey(0)
    kp, kx1, ky1, kx2, ky2, ku = jax.random.split(key, 6)
    params = init_params(kp)
    x_spt = jax.random.normal(kx1, (SPT, ITEM_LEN), jnp.float32)
    y_spt = jax.random.normal(ky1, (SPT,), jnp.float32)
    x_qry = jax.random.normal(kx2, (QRY, ITEM_LEN), jnp.float32)
    y_qry = jax.random.normal(ky2, (QRY,), jnp.float32)
    user_pf = jax.random.normal(ku, (USER_LEN,), jnp.float32)

    fwd = jax.jit(meta_forward)
    pred_outer, loss_outer = fwd(params, x_spt, y_spt, x_qry, y_qry, user_pf)
    jax.block_until_ready((pred_outer, loss_outer))
    assert pred_outer.shape == (QRY,) and loss_outer.shape == ()
    assert bool(jnp.all(jnp.isfinite(pred_outer))) and bool(jnp.isfinite(loss_outer))
    print("KERNEL_OK")
</pallas_src>

<mosaic_0001>
module attributes {stable_mosaic.version = 11 : i64} {
  func.func @_embed_cluster_adapt_kernel(%arg0: memref<1x16xf32, #tpu.memory_space<vmem>>, %arg1: memref<16x16xf32, #tpu.memory_space<vmem>>, %arg2: memref<16x16xf32, #tpu.memory_space<vmem>>, %arg3: memref<2x16xf32, #tpu.memory_space<vmem>>, %arg4: memref<16x32xf32, #tpu.memory_space<vmem>>, %arg5: memref<1x32xf32, #tpu.memory_space<vmem>>, %arg6: memref<2x16xf32, #tpu.memory_space<vmem>>, %arg7: memref<16x32xf32, #tpu.memory_space<vmem>>, %arg8: memref<1x32xf32, #tpu.memory_space<vmem>>, %arg9: memref<1x16xf32, #tpu.memory_space<vmem>>, %arg10: memref<16x16xf32, #tpu.memory_space<vmem>>, %arg11: memref<1x16xf32, #tpu.memory_space<vmem>>, %arg12: memref<16x896xf32, #tpu.memory_space<vmem>>, %arg13: memref<16x896xf32, #tpu.memory_space<vmem>>, %arg14: memref<1x896xf32, #tpu.memory_space<vmem>>, %arg15: memref<1x896xf32, #tpu.memory_space<vmem>>, %arg16: memref<1x896xf32, #tpu.memory_space<vmem>>) attributes {dimension_semantics = [], scalar_prefetch = 0 : i64, scratch_operands = 0 : i64, tpu.core_type = #tpu.core_type<tc>} {
    %c0 = arith.constant 0 : index
    %c0_0 = arith.constant 0 : index
    %0 = vector.load %arg0[%c0, %c0_0] : memref<1x16xf32, #tpu.memory_space<vmem>>, vector<1x16xf32>
    %c0_1 = arith.constant 0 : index
    %c0_2 = arith.constant 0 : index
    %1 = vector.load %arg1[%c0_1, %c0_2] : memref<16x16xf32, #tpu.memory_space<vmem>>, vector<16x16xf32>
    %cst = arith.constant dense<0.000000e+00> : vector<1x16xf32>
    %2 = tpu.matmul %0, %1, %cst {dimension_numbers = #tpu.dot_dimension_numbers<[1], [0], [0], [1], [0, 0, 1, 1], [], []>} : vector<1x16xf32>, vector<16x16xf32>, vector<1x16xf32> -> vector<1x16xf32>
    %c0_3 = arith.constant 0 : index
    %c0_4 = arith.constant 0 : index
    %3 = vector.load %arg2[%c0_3, %c0_4] : memref<16x16xf32, #tpu.memory_space<vmem>>, vector<16x16xf32>
    %cst_5 = arith.constant dense<0.000000e+00> : vector<1x16xf32>
    %4 = tpu.matmul %2, %3, %cst_5 {dimension_numbers = #tpu.dot_dimension_numbers<[1], [0], [0], [1], [0, 0, 1, 1], [], []>} : vector<1x16xf32>, vector<16x16xf32>, vector<1x16xf32> -> vector<1x16xf32>
    %c0_6 = arith.constant 0 : index
    %c0_7 = arith.constant 0 : index
    %5 = vector.load %arg3[%c0_6, %c0_7] : memref<2x16xf32, #tpu.memory_space<vmem>>, vector<2x16xf32>
    %c0_8 = arith.constant 0 : index
    %c0_9 = arith.constant 0 : index
    %6 = vector.load %arg4[%c0_8, %c0_9] : memref<16x32xf32, #tpu.memory_space<vmem>>, vector<16x32xf32>
    %c0_10 = arith.constant 0 : index
    %c0_11 = arith.constant 0 : index
    %7 = vector.load %arg5[%c0_10, %c0_11] : memref<1x32xf32, #tpu.memory_space<vmem>>, vector<1x32xf32>
    %8 = vector.broadcast %4 : vector<1x16xf32> to vector<2x16xf32>
    %9 = arith.subf %5, %8 : vector<2x16xf32>
    %10 = arith.mulf %9, %9 : vector<2x16xf32>
    %cst_12 = arith.constant dense<0.000000e+00> : vector<2xf32>
    %11 = vector.multi_reduction <add>, %10, %cst_12 [1] : vector<2x16xf32> to vector<2xf32>
    %12 = vector.shape_cast %11 : vector<2xf32> to vector<2x1xf32>
    %cst_13 = arith.constant 9.99999996E-13 : f32
    %13 = vector.broadcast %cst_13 : f32 to vector<2x1xf32>
    %14 = arith.addf %12, %13 : vector<2x1xf32>
    %15 = math.sqrt %14 : vector<2x1xf32>
    %cst_14 = arith.constant 0.000000e+00 : f32
    %16 = vector.broadcast %cst_14 : f32 to vector<2x1xf32>
    %17 = arith.subf %16, %15 : vector<2x1xf32>
    %cst_15 = arith.constant dense<0xFF800000> : vector<1xf32>
    %18 = vector.multi_reduction <maximumf>, %17, %cst_15 [0] : vector<2x1xf32> to vector<1xf32>
    %19 = vector.shape_cast %18 : vector<1xf32> to vector<1x1xf32>
    %20 = vector.broadcast %19 : vector<1x1xf32> to vector<2x1xf32>
    %21 = arith.subf %17, %20 : vector<2x1xf32>
    %22 = math.exp %21 : vector<2x1xf32>
    %cst_16 = arith.constant dense<0.000000e+00> : vector<1xf32>
    %23 = vector.multi_reduction <add>, %22, %cst_16 [0] : vector<2x1xf32> to vector<1xf32>
    %24 = vector.shape_cast %23 : vector<1xf32> to vector<1x1xf32>
    %25 = vector.broadcast %24 : vector<1x1xf32> to vector<2x1xf32>
    %26 = arith.divf %22, %25 : vector<2x1xf32>
    %cst_17 = arith.constant dense<0.000000e+00> : vector<1x32xf32>
    %27 = tpu.matmul %4, %6, %cst_17 {dimension_numbers = #tpu.dot_dimension_numbers<[1], [0], [0], [1], [0, 0, 1, 1], [], []>} : vector<1x16xf32>, vector<16x32xf32>, vector<1x32xf32> -> vector<1x32xf32>
    %28 = arith.addf %27, %7 : vector<1x32xf32>
    %29 = math.tanh %28 : vector<1x32xf32>
    %30 = vector.extract_strided_slice %26 {offsets = [0, 0], sizes = [1, 1], strides = [1, 1]} : vector<2x1xf32> to vector<1x1xf32>
    %31 = vector.extract_strided_slice %29 {offsets = [0, 0], sizes = [1, 16], strides = [1, 1]} : vector<1x32xf32> to vector<1x16xf32>
    %32 = vector.broadcast %30 : vector<1x1xf32> to vector<1x16xf32>
    %33 = arith.mulf %32, %31 : vector<1x16xf32>
    %34 = vector.extract_strided_slice %26 {offsets = [1, 0], sizes = [1, 1], strides = [1, 1]} : vector<2x1xf32> to vector<1x1xf32>
    %35 = vector.extract_strided_slice %29 {offsets = [0, 16], sizes = [1, 16], strides = [1, 1]} : vector<1x32xf32> to vector<1x16xf32>
    %36 = vector.broadcast %34 : vector<1x1xf32> to vector<1x16xf32>
    %37 = arith.mulf %36, %35 : vector<1x16xf32>
    %38 = arith.addf %33, %37 : vector<1x16xf32>
    %c0_18 = arith.constant 0 : index
    %c0_19 = arith.constant 0 : index
    %39 = vector.load %arg6[%c0_18, %c0_19] : memref<2x16xf32, #tpu.memory_space<vmem>>, vector<2x16xf32>
    %c0_20 = arith.constant 0 : index
    %c0_21 = arith.constant 0 : index
    %40 = vector.load %arg7[%c0_20, %c0_21] : memref<16x32xf32, #tpu.memory_space<vmem>>, vector<16x32xf32>
    %c0_22 = arith.constant 0 : index
    %c0_23 = arith.constant 0 : index
    %41 = vector.load %arg8[%c0_22, %c0_23] : memref<1x32xf32, #tpu.memory_space<vmem>>, vector<1x32xf32>
    %42 = vector.broadcast %38 : vector<1x16xf32> to vector<2x16xf32>
    %43 = arith.subf %39, %42 : vector<2x16xf32>
    %44 = arith.mulf %43, %43 : vector<2x16xf32>
    %cst_24 = arith.constant dense<0.000000e+00> : vector<2xf32>
    %45 = vector.multi_reduction <add>, %44, %cst_24 [1] : vector<2x16xf32> to vector<2xf32>
    %46 = vector.shape_cast %45 : vector<2xf32> to vector<2x1xf32>
    %cst_25 = arith.constant 9.99999996E-13 : f32
    %47 = vector.broadcast %cst_25 : f32 to vector<2x1xf32>
    %48 = arith.addf %46, %47 : vector<2x1xf32>
    %49 = math.sqrt %48 : vector<2x1xf32>
    %cst_26 = arith.constant 0.000000e+00 : f32
    %50 = vector.broadcast %cst_26 : f32 to vector<2x1xf32>
    %51 = arith.subf %50, %49 : vector<2x1xf32>
    %cst_27 = arith.constant dense<0xFF800000> : vector<1xf32>
    %52 = vector.multi_reduction <maximumf>, %51, %cst_27 [0] : vector<2x1xf32> to vector<1xf32>
    %53 = vector.shape_cast %52 : vector<1xf32> to vector<1x1xf32>
    %54 = vector.broadcast %53 : vector<1x1xf32> to vector<2x1xf32>
    %55 = arith.subf %51, %54 : vector<2x1xf32>
    %56 = math.exp %55 : vector<2x1xf32>
    %cst_28 = arith.constant dense<0.000000e+00> : vector<1xf32>
    %57 = vector.multi_reduction <add>, %56, %cst_28 [0] : vector<2x1xf32> to vector<1xf32>
    %58 = vector.shape_cast %57 : vector<1xf32> to vector<1x1xf32>
    %59 = vector.broadcast %58 : vector<1x1xf32> to vector<2x1xf32>
    %60 = arith.divf %56, %59 : vector<2x1xf32>
    %cst_29 = arith.constant dense<0.000000e+00> : vector<1x32xf32>
    %61 = tpu.matmul %38, %40, %cst_29 {dimension_numbers = #tpu.dot_dimension_numbers<[1], [0], [0], [1], [0, 0, 1, 1], [], []>} : vector<1x16xf32>, vector<16x32xf32>, vector<1x32xf32> -> vector<1x32xf32>
    %62 = arith.addf %61, %41 : vector<1x32xf32>
    %63 = math.tanh %62 : vector<1x32xf32>
    %64 = vector.extract_strided_slice %60 {offsets = [0, 0], sizes = [1, 1], strides = [1, 1]} : vector<2x1xf32> to vector<1x1xf32>
    %65 = vector.extract_strided_slice %63 {offsets = [0, 0], sizes = [1, 16], strides = [1, 1]} : vector<1x32xf32> to vector<1x16xf32>
    %66 = vector.broadcast %64 : vector<1x1xf32> to vector<1x16xf32>
    %67 = arith.mulf %66, %65 : vector<1x16xf32>
    %68 = vector.extract_strided_slice %60 {offsets = [1, 0], sizes = [1, 1], strides = [1, 1]} : vector<2x1xf32> to vector<1x1xf32>
    %69 = vector.extract_strided_slice %63 {offsets = [0, 16], sizes = [1, 16], strides = [1, 1]} : vector<1x32xf32> to vector<1x16xf32>
    %70 = vector.broadcast %68 : vector<1x1xf32> to vector<1x16xf32>
    %71 = arith.mulf %70, %69 : vector<1x16xf32>
    %72 = arith.addf %67, %71 : vector<1x16xf32>
    %c0_30 = arith.constant 0 : index
    %c0_31 = arith.constant 0 : index
    %73 = vector.load %arg9[%c0_30, %c0_31] : memref<1x16xf32, #tpu.memory_space<vmem>>, vector<1x16xf32>
    %c0_32 = arith.constant 0 : index
    %c0_33 = arith.constant 0 : index
    %74 = vector.load %arg10[%c0_32, %c0_33] : memref<16x16xf32, #tpu.memory_space<vmem>>, vector<16x16xf32>
    %c0_34 = arith.constant 0 : index
    %c0_35 = arith.constant 0 : index
    %75 = vector.load %arg11[%c0_34, %c0_35] : memref<1x16xf32, #tpu.memory_space<vmem>>, vector<1x16xf32>
    %76 = arith.subf %73, %72 : vector<1x16xf32>
    %77 = arith.mulf %76, %76 : vector<1x16xf32>
    %cst_36 = arith.constant dense<0.000000e+00> : vector<1xf32>
    %78 = vector.multi_reduction <add>, %77, %cst_36 [1] : vector<1x16xf32> to vector<1xf32>
    %79 = vector.shape_cast %78 : vector<1xf32> to vector<1x1xf32>
    %cst_37 = arith.constant 9.99999996E-13 : f32
    %80 = vector.broadcast %cst_37 : f32 to vector<1x1xf32>
    %81 = arith.addf %79, %80 : vector<1x1xf32>
    %82 = math.sqrt %81 : vector<1x1xf32>
    %cst_38 = arith.constant 0.000000e+00 : f32
    %83 = vector.broadcast %cst_38 : f32 to vector<1x1xf32>
    %84 = arith.subf %83, %82 : vector<1x1xf32>
    %cst_39 = arith.constant dense<0xFF800000> : vector<1xf32>
    %85 = vector.multi_reduction <maximumf>, %84, %cst_39 [0] : vector<1x1xf32> to vector<1xf32>
    %86 = vector.shape_cast %85 : vector<1xf32> to vector<1x1xf32>
    %87 = arith.subf %84, %86 : vector<1x1xf32>
    %88 = math.exp %87 : vector<1x1xf32>
    %cst_40 = arith.constant dense<0.000000e+00> : vector<1xf32>
    %89 = vector.multi_reduction <add>, %88, %cst_40 [0] : vector<1x1xf32> to vector<1xf32>
    %90 = vector.shape_cast %89 : vector<1xf32> to vector<1x1xf32>
    %91 = arith.divf %88, %90 : vector<1x1xf32>
    %cst_41 = arith.constant dense<0.000000e+00> : vector<1x16xf32>
    %92 = tpu.matmul %72, %74, %cst_41 {dimension_numbers = #tpu.dot_dimension_numbers<[1], [0], [0], [1], [0, 0, 1, 1], [], []>} : vector<1x16xf32>, vector<16x16xf32>, vector<1x16xf32> -> vector<1x16xf32>
    %93 = arith.addf %92, %75 : vector<1x16xf32>
    %94 = math.tanh %93 : vector<1x16xf32>
    %95 = vector.broadcast %91 : vector<1x1xf32> to vector<1x16xf32>
    %96 = arith.mulf %95, %94 : vector<1x16xf32>
    %c0_42 = arith.constant 0 : index
    %c0_43 = arith.constant 0 : index
    %97 = vector.load %arg12[%c0_42, %c0_43] : memref<16x896xf32, #tpu.memory_space<vmem>>, vector<16x896xf32>
    %cst_44 = arith.constant dense<0.000000e+00> : vector<1x896xf32>
    %98 = tpu.matmul %4, %97, %cst_44 {dimension_numbers = #tpu.dot_dimension_numbers<[1], [0], [0], [1], [0, 0, 1, 1], [], []>} : vector<1x16xf32>, vector<16x896xf32>, vector<1x896xf32> -> vector<1x896xf32>
    %c0_45 = arith.constant 0 : index
    %c0_46 = arith.constant 0 : index
    %99 = vector.load %arg13[%c0_45, %c0_46] : memref<16x896xf32, #tpu.memory_space<vmem>>, vector<16x896xf32>
    %cst_47 = arith.constant dense<0.000000e+00> : vector<1x896xf32>
    %100 = tpu.matmul %96, %99, %cst_47 {dimension_numbers = #tpu.dot_dimension_numbers<[1], [0], [0], [1], [0, 0, 1, 1], [], []>} : vector<1x16xf32>, vector<16x896xf32>, vector<1x896xf32> -> vector<1x896xf32>
    %101 = arith.addf %98, %100 : vector<1x896xf32>
    %c0_48 = arith.constant 0 : index
    %c0_49 = arith.constant 0 : index
    %102 = vector.load %arg14[%c0_48, %c0_49] : memref<1x896xf32, #tpu.memory_space<vmem>>, vector<1x896xf32>
    %103 = arith.addf %101, %102 : vector<1x896xf32>
    %104 = arith.negf %103 : vector<1x896xf32>
    %105 = math.exp %104 : vector<1x896xf32>
    %cst_50 = arith.constant 1.000000e+00 : f32
    %106 = vector.broadcast %cst_50 : f32 to vector<1x896xf32>
    %107 = arith.addf %106, %105 : vector<1x896xf32>
    %108 = arith.divf %106, %107 : vector<1x896xf32>
    %c0_51 = arith.constant 0 : index
    %c0_52 = arith.constant 0 : index
    %109 = vector.load %arg15[%c0_51, %c0_52] : memref<1x896xf32, #tpu.memory_space<vmem>>, vector<1x896xf32>
    %110 = arith.mulf %108, %109 : vector<1x896xf32>
    %c0_53 = arith.constant 0 : index
    %c0_54 = arith.constant 0 : index
    %111 = vector.load %arg16[%c0_53, %c0_54] : memref<1x896xf32, #tpu.memory_space<vmem>>, vector<1x896xf32>
    tpu.vector_store %arg16[%c0_53, %c0_54], %110 {strides = array<i32>} : memref<1x896xf32, #tpu.memory_space<vmem>>, vector<1x896xf32>,
    return
  }
}

module attributes {stable_mosaic.version = 11 : i64} {
  func.func @_inner_sgd_query_kernel(%arg0: memref<8x8xf32, #tpu.memory_space<vmem>>, %arg1: memref<8x8xf32, #tpu.memory_space<vmem>>, %arg2: memref<8x1xf32, #tpu.memory_space<vmem>>, %arg3: memref<8x8xf32, #tpu.memory_space<vmem>>, %arg4: memref<8x1xf32, #tpu.memory_space<vmem>>, %arg5: memref<16x1xf32, #tpu.memory_space<vmem>>, %arg6: memref<8x32xf32, #tpu.memory_space<vmem>>, %arg7: memref<16x32xf32, #tpu.memory_space<vmem>>, %arg8: memref<1x32xf32, #tpu.memory_space<vmem>>, %arg9: memref<1x32xf32, #tpu.memory_space<vmem>>, %arg10: memref<1x1xf32, #tpu.memory_space<vmem>>, %arg11: memref<8x1xf32, #tpu.memory_space<vmem>>, %arg12: memref<1x1xf32, #tpu.memory_space<vmem>>) attributes {dimension_semantics = [], scalar_prefetch = 0 : i64, scratch_operands = 0 : i64, tpu.core_type = #tpu.core_type<tc>} {
    %c0 = arith.constant 0 : index
    %c0_0 = arith.constant 0 : index
    %0 = vector.load %arg0[%c0, %c0_0] : memref<8x8xf32, #tpu.memory_space<vmem>>, vector<8x8xf32>
    %c0_1 = arith.constant 0 : index
    %c0_2 = arith.constant 0 : index
    %1 = vector.load %arg1[%c0_1, %c0_2] : memref<8x8xf32, #tpu.memory_space<vmem>>, vector<8x8xf32>
    %c0_3 = arith.constant 0 : index
    %c0_4 = arith.constant 0 : index
    %2 = vector.load %arg2[%c0_3, %c0_4] : memref<8x1xf32, #tpu.memory_space<vmem>>, vector<8x1xf32>
    %c0_5 = arith.constant 0 : index
    %c0_6 = arith.constant 0 : index
    %3 = vector.load %arg5[%c0_5, %c0_6] : memref<16x1xf32, #tpu.memory_space<vmem>>, vector<16x1xf32>
    %c0_7 = arith.constant 0 : index
    %c0_8 = arith.constant 0 : index
    %4 = vector.load %arg6[%c0_7, %c0_8] : memref<8x32xf32, #tpu.memory_space<vmem>>, vector<8x32xf32>
    %c0_9 = arith.constant 0 : index
    %c0_10 = arith.constant 0 : index
    %5 = vector.load %arg7[%c0_9, %c0_10] : memref<16x32xf32, #tpu.memory_space<vmem>>, vector<16x32xf32>
    %c0_11 = arith.constant 0 : index
    %c0_12 = arith.constant 0 : index
    %6 = vector.load %arg8[%c0_11, %c0_12] : memref<1x32xf32, #tpu.memory_space<vmem>>, vector<1x32xf32>
    %c0_13 = arith.constant 0 : index
    %c0_14 = arith.constant 0 : index
    %7 = vector.load %arg9[%c0_13, %c0_14] : memref<1x32xf32, #tpu.memory_space<vmem>>, vector<1x32xf32>
    %c0_15 = arith.constant 0 : index
    %c0_16 = arith.constant 0 : index
    %8 = vector.load %arg10[%c0_15, %c0_16] : memref<1x1xf32, #tpu.memory_space<vmem>>, vector<1x1xf32>
    %9 = vector.broadcast %3 : vector<16x1xf32> to vector<16x32xf32>
    %10 = arith.mulf %9, %5 : vector<16x32xf32>
    %cst = arith.constant dense<0.000000e+00> : vector<32xf32>
    %11 = vector.multi_reduction <add>, %10, %cst [0] : vector<16x32xf32> to vector<32xf32>
    %12 = vector.shape_cast %11 : vector<32xf32> to vector<1x32xf32>
    %cst_17 = arith.constant dense<0.000000e+00> : vector<8x32xf32>
    %13 = tpu.matmul %0, %4, %cst_17 {dimension_numbers = #tpu.dot_dimension_numbers<[1], [0], [0], [1], [0, 0, 1, 1], [], []>} : vector<8x8xf32>, vector<8x32xf32>, vector<8x32xf32> -> vector<8x32xf32>
    %14 = vector.broadcast %12 : vector<1x32xf32> to vector<8x32xf32>
    %15 = arith.addf %13, %14 : vector<8x32xf32>
    %16 = vector.broadcast %6 : vector<1x32xf32> to vector<8x32xf32>
    %17 = arith.addf %15, %16 : vector<8x32xf32>
    %cst_18 = arith.constant 0.000000e+00 : f32
    %18 = vector.broadcast %cst_18 : f32 to vector<8x32xf32>
    %19 = arith.maximumf %17, %18 : vector<8x32xf32>
    %20 = vector.broadcast %7 : vector<1x32xf32> to vector<8x32xf32>
    %21 = arith.mulf %19, %20 : vector<8x32xf32>
    %cst_19 = arith.constant dense<0.000000e+00> : vector<8xf32>
    %22 = vector.multi_reduction <add>, %21, %cst_19 [1] : vector<8x32xf32> to vector<8xf32>
    %23 = vector.shape_cast %22 : vector<8xf32> to vector<8x1xf32>
    %24 = vector.broadcast %8 : vector<1x1xf32> to vector<8x1xf32>
    %25 = arith.addf %23, %24 : vector<8x1xf32>
    %26 = arith.subf %25, %2 : vector<8x1xf32>
    %cst_20 = arith.constant 2.500000e-01 : f32
    %27 = vector.broadcast %cst_20 : f32 to vector<8x1xf32>
    %28 = arith.mulf %27, %26 : vector<8x1xf32>
    %cst_21 = arith.constant dense<0.000000e+00> : vector<1xf32>
    %29 = vector.multi_reduction <add>, %28, %cst_21 [0] : vector<8x1xf32> to vector<1xf32>
    %30 = vector.shape_cast %29 : vector<1xf32> to vector<1x1xf32>
    %31 = vector.broadcast %28 : vector<8x1xf32> to vector<8x32xf32>
    %32 = arith.mulf %31, %19 : vector<8x32xf32>
    %cst_22 = arith.constant dense<0.000000e+00> : vector<32xf32>
    %33 = vector.multi_reduction <add>, %32, %cst_22 [0] : vector<8x32xf32> to vector<32xf32>
    %34 = vector.shape_cast %33 : vector<32xf32> to vector<1x32xf32>
    %cst_23 = arith.constant 0.000000e+00 : f32
    %35 = vector.broadcast %cst_23 : f32 to vector<8x32xf32>
    %36 = arith.cmpf ogt, %17, %35 : vector<8x32xf32>
    %37 = vector.broadcast %28 : vector<8x1xf32> to vector<8x32xf32>
    %38 = vector.broadcast %7 : vector<1x32xf32> to vector<8x32xf32>
    %39 = arith.mulf %37, %38 : vector<8x32xf32>
    %cst_24 = arith.constant 0.000000e+00 : f32
    %40 = vector.broadcast %cst_24 : f32 to vector<8x32xf32>
    %41 = arith.select %36, %39, %40 : vector<8x32xi1>, vector<8x32xf32>
    %cst_25 = arith.constant dense<0.000000e+00> : vector<32xf32>
    %42 = vector.multi_reduction <add>, %41, %cst_25 [0] : vector<8x32xf32> to vector<32xf32>
    %43 = vector.shape_cast %42 : vector<32xf32> to vector<1x32xf32>
    %cst_26 = arith.constant dense<0.000000e+00> : vector<8x32xf32>
    %44 = tpu.matmul %1, %41, %cst_26 {dimension_numbers = #tpu.dot_dimension_numbers<[1], [0], [0], [1], [0, 0, 1, 1], [], []>} : vector<8x8xf32>, vector<8x32xf32>, vector<8x32xf32> -> vector<8x32xf32>
    %45 = vector.broadcast %3 : vector<16x1xf32> to vector<16x32xf32>
    %46 = vector.broadcast %43 : vector<1x32xf32> to vector<16x32xf32>
    %47 = arith.mulf %45, %46 : vector<16x32xf32>
    %cst_27 = arith.constant 1.000000e-03 : f32
    %48 = vector.broadcast %cst_27 : f32 to vector<8x32xf32>
    %49 = arith.mulf %48, %44 : vector<8x32xf32>
    %50 = arith.subf %4, %49 : vector<8x32xf32>
    %cst_28 = arith.constant 1.000000e-03 : f32
    %51 = vector.broadcast %cst_28 : f32 to vector<16x32xf32>
    %52 = arith.mulf %51, %47 : vector<16x32xf32>
    %53 = arith.subf %5, %52 : vector<16x32xf32>
    %cst_29 = arith.constant 1.000000e-03 : f32
    %54 = vector.broadcast %cst_29 : f32 to vector<1x32xf32>
    %55 = arith.mulf %54, %43 : vector<1x32xf32>
    %56 = arith.subf %6, %55 : vector<1x32xf32>
    %cst_30 = arith.constant 1.000000e-03 : f32
    %57 = vector.broadcast %cst_30 : f32 to vector<1x32xf32>
    %58 = arith.mulf %57, %34 : vector<1x32xf32>
    %59 = arith.subf %7, %58 : vector<1x32xf32>
    %cst_31 = arith.constant 1.000000e-03 : f32
    %60 = vector.broadcast %cst_31 : f32 to vector<1x1xf32>
    %61 = arith.mulf %60, %30 : vector<1x1xf32>
    %62 = arith.subf %8, %61 : vector<1x1xf32>
    %63 = vector.broadcast %3 : vector<16x1xf32> to vector<16x32xf32>
    %64 = arith.mulf %63, %53 : vector<16x32xf32>
    %cst_32 = arith.constant dense<0.000000e+00> : vector<32xf32>
    %65 = vector.multi_reduction <add>, %64, %cst_32 [0] : vector<16x32xf32> to vector<32xf32>
    %66 = vector.shape_cast %65 : vector<32xf32> to vector<1x32xf32>
    %cst_33 = arith.constant dense<0.000000e+00> : vector<8x32xf32>
    %67 = tpu.matmul %0, %50, %cst_33 {dimension_numbers = #tpu.dot_dimension_numbers<[1], [0], [0], [1], [0, 0, 1, 1], [], []>} : vector<8x8xf32>, vector<8x32xf32>, vector<8x32xf32> -> vector<8x32xf32>
    %68 = vector.broadcast %66 : vector<1x32xf32> to vector<8x32xf32>
    %69 = arith.addf %67, %68 : vector<8x32xf32>
    %70 = vector.broadcast %56 : vector<1x32xf32> to vector<8x32xf32>
    %71 = arith.addf %69, %70 : vector<8x32xf32>
    %cst_34 = arith.constant 0.000000e+00 : f32
    %72 = vector.broadcast %cst_34 : f32 to vector<8x32xf32>
    %73 = arith.maximumf %71, %72 : vector<8x32xf32>
    %74 = vector.broadcast %59 : vector<1x32xf32> to vector<8x32xf32>
    %75 = arith.mulf %73, %74 : vector<8x32xf32>
    %cst_35 = arith.constant dense<0.000000e+00> : vector<8xf32>
    %76 = vector.multi_reduction <add>, %75, %cst_35 [1] : vector<8x32xf32> to vector<8xf32>
    %77 = vector.shape_cast %76 : vector<8xf32> to vector<8x1xf32>
    %78 = vector.broadcast %62 : vector<1x1xf32> to vector<8x1xf32>
    %79 = arith.addf %77, %78 : vector<8x1xf32>
    %80 = arith.subf %79, %2 : vector<8x1xf32>
    %cst_36 = arith.constant 2.500000e-01 : f32
    %81 = vector.broadcast %cst_36 : f32 to vector<8x1xf32>
    %82 = arith.mulf %81, %80 : vector<8x1xf32>
    %cst_37 = arith.constant dense<0.000000e+00> : vector<1xf32>
    %83 = vector.multi_reduction <add>, %82, %cst_37 [0] : vector<8x1xf32> to vector<1xf32>
    %84 = vector.shape_cast %83 : vector<1xf32> to vector<1x1xf32>
    %85 = vector.broadcast %82 : vector<8x1xf32> to vector<8x32xf32>
    %86 = arith.mulf %85, %73 : vector<8x32xf32>
    %cst_38 = arith.constant dense<0.000000e+00> : vector<32xf32>
    %87 = vector.multi_reduction <add>, %86, %cst_38 [0] : vector<8x32xf32> to vector<32xf32>
    %88 = vector.shape_cast %87 : vector<32xf32> to vector<1x32xf32>
    %cst_39 = arith.constant 0.000000e+00 : f32
    %89 = vector.broadcast %cst_39 : f32 to vector<8x32xf32>
    %90 = arith.cmpf ogt, %71, %89 : vector<8x32xf32>
    %91 = vector.broadcast %82 : vector<8x1xf32> to vector<8x32xf32>
    %92 = vector.broadcast %59 : vector<1x32xf32> to vector<8x32xf32>
    %93 = arith.mulf %91, %92 : vector<8x32xf32>
    %cst_40 = arith.constant 0.000000e+00 : f32
    %94 = vector.broadcast %cst_40 : f32 to vector<8x32xf32>
    %95 = arith.select %90, %93, %94 : vector<8x32xi1>, vector<8x32xf32>
    %cst_41 = arith.constant dense<0.000000e+00> : vector<32xf32>
    %96 = vector.multi_reduction <add>, %95, %cst_41 [0] : vector<8x32xf32> to vector<32xf32>
    %97 = vector.shape_cast %96 : vector<32xf32> to vector<1x32xf32>
    %cst_42 = arith.constant dense<0.000000e+00> : vector<8x32xf32>
    %98 = tpu.matmul %1, %95, %cst_42 {dimension_numbers = #tpu.dot_dimension_numbers<[1], [0], [0], [1], [0, 0, 1, 1], [], []>} : vector<8x8xf32>, vector<8x32xf32>, vector<8x32xf32> -> vector<8x32xf32>
    %99 = vector.broadcast %3 : vector<16x1xf32> to vector<16x32xf32>
    %100 = vector.broadcast %97 : vector<1x32xf32> to vector<16x32xf32>
    %101 = arith.mulf %99, %100 : vector<16x32xf32>
    %cst_43 = arith.constant 1.000000e-03 : f32
    %102 = vector.broadcast %cst_43 : f32 to vector<8x32xf32>
    %103 = arith.mulf %102, %98 : vector<8x32xf32>
    %104 = arith.subf %50, %103 : vector<8x32xf32>
    %cst_44 = arith.constant 1.000000e-03 : f32
    %105 = vector.broadcast %cst_44 : f32 to vector<16x32xf32>
    %106 = arith.mulf %105, %101 : vector<16x32xf32>
    %107 = arith.subf %53, %106 : vector<16x32xf32>
    %cst_45 = arith.constant 1.000000e-03 : f32
    %108 = vector.broadcast %cst_45 : f32 to vector<1x32xf32>
    %109 = arith.mulf %108, %97 : vector<1x32xf32>
    %110 = arith.subf %56, %109 : vector<1x32xf32>
    %cst_46 = arith.constant 1.000000e-03 : f32
    %111 = vector.broadcast %cst_46 : f32 to vector<1x32xf32>
    %112 = arith.mulf %111, %88 : vector<1x32xf32>
    %113 = arith.subf %59, %112 : vector<1x32xf32>
    %cst_47 = arith.constant 1.000000e-03 : f32
    %114 = vector.broadcast %cst_47 : f32 to vector<1x1xf32>
    %115 = arith.mulf %114, %84 : vector<1x1xf32>
    %116 = arith.subf %62, %115 : vector<1x1xf32>
    %117 = vector.broadcast %3 : vector<16x1xf32> to vector<16x32xf32>
    %118 = arith.mulf %117, %107 : vector<16x32xf32>
    %cst_48 = arith.constant dense<0.000000e+00> : vector<32xf32>
    %119 = vector.multi_reduction <add>, %118, %cst_48 [0] : vector<16x32xf32> to vector<32xf32>
    %120 = vector.shape_cast %119 : vector<32xf32> to vector<1x32xf32>
    %cst_49 = arith.constant dense<0.000000e+00> : vector<8x32xf32>
    %121 = tpu.matmul %0, %104, %cst_49 {dimension_numbers = #tpu.dot_dimension_numbers<[1], [0], [0], [1], [0, 0, 1, 1], [], []>} : vector<8x8xf32>, vector<8x32xf32>, vector<8x32xf32> -> vector<8x32xf32>
    %122 = vector.broadcast %120 : vector<1x32xf32> to vector<8x32xf32>
    %123 = arith.addf %121, %122 : vector<8x32xf32>
    %124 = vector.broadcast %110 : vector<1x32xf32> to vector<8x32xf32>
    %125 = arith.addf %123, %124 : vector<8x32xf32>
    %cst_50 = arith.constant 0.000000e+00 : f32
    %126 = vector.broadcast %cst_50 : f32 to vector<8x32xf32>
    %127 = arith.maximumf %125, %126 : vector<8x32xf32>
    %128 = vector.broadcast %113 : vector<1x32xf32> to vector<8x32xf32>
    %129 = arith.mulf %127, %128 : vector<8x32xf32>
    %cst_51 = arith.constant dense<0.000000e+00> : vector<8xf32>
    %130 = vector.multi_reduction <add>, %129, %cst_51 [1] : vector<8x32xf32> to vector<8xf32>
    %131 = vector.shape_cast %130 : vector<8xf32> to vector<8x1xf32>
    %132 = vector.broadcast %116 : vector<1x1xf32> to vector<8x1xf32>
    %133 = arith.addf %131, %132 : vector<8x1xf32>
    %134 = arith.subf %133, %2 : vector<8x1xf32>
    %cst_52 = arith.constant 2.500000e-01 : f32
    %135 = vector.broadcast %cst_52 : f32 to vector<8x1xf32>
    %136 = arith.mulf %135, %134 : vector<8x1xf32>
    %cst_53 = arith.constant dense<0.000000e+00> : vector<1xf32>
    %137 = vector.multi_reduction <add>, %136, %cst_53 [0] : vector<8x1xf32> to vector<1xf32>
    %138 = vector.shape_cast %137 : vector<1xf32> to vector<1x1xf32>
    %139 = vector.broadcast %136 : vector<8x1xf32> to vector<8x32xf32>
    %140 = arith.mulf %139, %127 : vector<8x32xf32>
    %cst_54 = arith.constant dense<0.000000e+00> : vector<32xf32>
    %141 = vector.multi_reduction <add>, %140, %cst_54 [0] : vector<8x32xf32> to vector<32xf32>
    %142 = vector.shape_cast %141 : vector<32xf32> to vector<1x32xf32>
    %cst_55 = arith.constant 0.000000e+00 : f32
    %143 = vector.broadcast %cst_55 : f32 to vector<8x32xf32>
    %144 = arith.cmpf ogt, %125, %143 : vector<8x32xf32>
    %145 = vector.broadcast %136 : vector<8x1xf32> to vector<8x32xf32>
    %146 = vector.broadcast %113 : vector<1x32xf32> to vector<8x32xf32>
    %147 = arith.mulf %145, %146 : vector<8x32xf32>
    %cst_56 = arith.constant 0.000000e+00 : f32
    %148 = vector.broadcast %cst_56 : f32 to vector<8x32xf32>
    %149 = arith.select %144, %147, %148 : vector<8x32xi1>, vector<8x32xf32>
    %cst_57 = arith.constant dense<0.000000e+00> : vector<32xf32>
    %150 = vector.multi_reduction <add>, %149, %cst_57 [0] : vector<8x32xf32> to vector<32xf32>
    %151 = vector.shape_cast %150 : vector<32xf32> to vector<1x32xf32>
    %cst_58 = arith.constant dense<0.000000e+00> : vector<8x32xf32>
    %152 = tpu.matmul %1, %149, %cst_58 {dimension_numbers = #tpu.dot_dimension_numbers<[1], [0], [0], [1], [0, 0, 1, 1], [], []>} : vector<8x8xf32>, vector<8x32xf32>, vector<8x32xf32> -> vector<8x32xf32>
    %153 = vector.broadcast %3 : vector<16x1xf32> to vector<16x32xf32>
    %154 = vector.broadcast %151 : vector<1x32xf32> to vector<16x32xf32>
    %155 = arith.mulf %153, %154 : vector<16x32xf32>
    %cst_59 = arith.constant 1.000000e-03 : f32
    %156 = vector.broadcast %cst_59 : f32 to vector<8x32xf32>
    %157 = arith.mulf %156, %152 : vector<8x32xf32>
    %158 = arith.subf %104, %157 : vector<8x32xf32>
    %cst_60 = arith.constant 1.000000e-03 : f32
    %159 = vector.broadcast %cst_60 : f32 to vector<16x32xf32>
    %160 = arith.mulf %159, %155 : vector<16x32xf32>
    %161 = arith.subf %107, %160 : vector<16x32xf32>
    %cst_61 = arith.constant 1.000000e-03 : f32
    %162 = vector.broadcast %cst_61 : f32 to vector<1x32xf32>
    %163 = arith.mulf %162, %151 : vector<1x32xf32>
    %164 = arith.subf %110, %163 : vector<1x32xf32>
    %cst_62 = arith.constant 1.000000e-03 : f32
    %165 = vector.broadcast %cst_62 : f32 to vector<1x32xf32>
    %166 = arith.mulf %165, %142 : vector<1x32xf32>
    %167 = arith.subf %113, %166 : vector<1x32xf32>
    %cst_63 = arith.constant 1.000000e-03 : f32
    %168 = vector.broadcast %cst_63 : f32 to vector<1x1xf32>
    %169 = arith.mulf %168, %138 : vector<1x1xf32>
    %170 = arith.subf %116, %169 : vector<1x1xf32>
    %c0_64 = arith.constant 0 : index
    %c0_65 = arith.constant 0 : index
    %171 = vector.load %arg3[%c0_64, %c0_65] : memref<8x8xf32, #tpu.memory_space<vmem>>, vector<8x8xf32>
    %172 = vector.broadcast %3 : vector<16x1xf32> to vector<16x32xf32>
    %173 = arith.mulf %172, %161 : vector<16x32xf32>
    %cst_66 = arith.constant dense<0.000000e+00> : vector<32xf32>
    %174 = vector.multi_reduction <add>, %173, %cst_66 [0] : vector<16x32xf32> to vector<32xf32>
    %175 = vector.shape_cast %174 : vector<32xf32> to vector<1x32xf32>
    %cst_67 = arith.constant dense<0.000000e+00> : vector<8x32xf32>
    %176 = tpu.matmul %171, %158, %cst_67 {dimension_numbers = #tpu.dot_dimension_numbers<[1], [0], [0], [1], [0, 0, 1, 1], [], []>} : vector<8x8xf32>, vector<8x32xf32>, vector<8x32xf32> -> vector<8x32xf32>
    %177 = vector.broadcast %175 : vector<1x32xf32> to vector<8x32xf32>
    %178 = arith.addf %176, %177 : vector<8x32xf32>
    %179 = vector.broadcast %164 : vector<1x32xf32> to vector<8x32xf32>
    %180 = arith.addf %178, %179 : vector<8x32xf32>
    %cst_68 = arith.constant 0.000000e+00 : f32
    %181 = vector.broadcast %cst_68 : f32 to vector<8x32xf32>
    %182 = arith.maximumf %180, %181 : vector<8x32xf32>
    %183 = vector.broadcast %167 : vector<1x32xf32> to vector<8x32xf32>
    %184 = arith.mulf %182, %183 : vector<8x32xf32>
    %cst_69 = arith.constant dense<0.000000e+00> : vector<8xf32>
    %185 = vector.multi_reduction <add>, %184, %cst_69 [1] : vector<8x32xf32> to vector<8xf32>
    %186 = vector.shape_cast %185 : vector<8xf32> to vector<8x1xf32>
    %187 = vector.broadcast %170 : vector<1x1xf32> to vector<8x1xf32>
    %188 = arith.addf %186, %187 : vector<8x1xf32>
    %c0_70 = arith.constant 0 : index
    %c0_71 = arith.constant 0 : index
    %189 = vector.load %arg4[%c0_70, %c0_71] : memref<8x1xf32, #tpu.memory_space<vmem>>, vector<8x1xf32>
    %190 = arith.subf %188, %189 : vector<8x1xf32>
    %c0_72 = arith.constant 0 : index
    %c0_73 = arith.constant 0 : index
    %191 = vector.load %arg11[%c0_72, %c0_73] : memref<8x1xf32, #tpu.memory_space<vmem>>, vector<8x1xf32>
    tpu.vector_store %arg11[%c0_72, %c0_73], %188 {strides = array<i32>} : memref<8x1xf32, #tpu.memory_space<vmem>>, vector<8x1xf32>,
    %192 = arith.mulf %190, %190 : vector<8x1xf32>
    %cst_74 = arith.constant dense<0.000000e+00> : vector<1xf32>
    %193 = vector.multi_reduction <add>, %192, %cst_74 [0] : vector<8x1xf32> to vector<1xf32>
    %194 = vector.shape_cast %193 : vector<1xf32> to vector<1x1xf32>
    %cst_75 = arith.constant 8.000000e+00 : f32
    %195 = vector.broadcast %cst_75 : f32 to vector<1x1xf32>
    %196 = arith.divf %194, %195 : vector<1x1xf32>
    %c0_76 = arith.constant 0 : index
    %c0_77 = arith.constant 0 : index
    %197 = vector.load %arg12[%c0_76, %c0_77] : memref<1x1xf32, #tpu.memory_space<vmem>>, vector<1x1xf32>
    tpu.vector_store %arg12[%c0_76, %c0_77], %196 {strides = array<i32>} : memref<1x1xf32, #tpu.memory_space<vmem>>, vector<1x1xf32>,
    return
  }
}

</mosaic_0001>

<bundles_post_ra>
// kernel: squeeze.3
= control target key start
LH: loop header
LB: loop body
LE: loop exit
PB: predicated region body
PF: predicated region fallthrough
CT: control target
= control target key end

     0   :  { %vm3_vm0 = vcmask 261120   ;;  %s29_s12 = smov 96   ;;  %s30_s13 = smov 32   ;;  %s70_s0 = inlined_call_operand.vmem [shape: f32[768], index: 0, kind: input, shape index: {}]   ;;  %s71_s1 = inlined_call_operand.vmem [shape: f32[24,32], index: 1, kind: output, shape index: {}]  }
   0x1   :  { %v5_v0 = vld [vmem:[%s70_s0] sm:$0x3f]  }
   0x2   :  { %v17_v1 = vld [vmem:[%s70_s0] sm:$0x3f]   ;;  %6 = vrot.lane.b32.xlu0 %v5_v0, %s29_s12 }
   0x3   :  { %v2_v2 = vld [vmem:[%s70_s0] sm:$0x3f]   ;;  %18 = vrot.lane.b32.xlu1 %v17_v1, %s30_s13 }
   0x4   :  { %4 = vst.msk [vmem:[%s71_s1] ss:$4 sm:$0x3f] %vm3_vm0, %v2_v2   ;;  %v11_v3 = vld [vmem:[%s70_s0] sm:$0x3f]   ;;  %s31_s0 = smov 64  }
   0xa   :  { %12 = vrot.lane.b32.xlu0 %v11_v3, %s31_s0 }
  0x74   :  { %v7_v4 = vpop.permute.xlu0 %6  }
  0x75   :  { %v19_v5 = vpop.permute.xlu1 %18   ;;  %23 = vst.msk [vmem:[%s71_s1 + $0x1] ss:$4 sm:$0x3f] %vm3_vm0, %v7_v4  }
  0x76   :  { %25 = vst.msk [vmem:[%s71_s1 + $0x3] ss:$4 sm:$0x3f] %vm3_vm0, %v19_v5  }
  0x7c   :  { %v13_v6 = vpop.permute.xlu0 %12  }
  0x7d   :  { %24 = vst.msk [vmem:[%s71_s1 + $0x2] ss:$4 sm:$0x3f] %vm3_vm0, %v13_v6  }

// kernel: meta_forward.3
= control target key start
LH: loop header
LB: loop body
LE: loop exit
PB: predicated region body
PF: predicated region fallthrough
CT: control target
= control target key end

     0   :  { %s781_s0 = inlined_call_operand.vmem [shape: f32[8,8], index: 0, kind: input, shape index: {}]   ;;  %s782_s1 = inlined_call_operand.vmem [shape: f32[8,8], index: 1, kind: input, shape index: {}]   ;;  %s783_s2 = inlined_call_operand.vmem [shape: f32[8,1], index: 2, kind: input, shape index: {}]   ;;  %s784_s3 = inlined_call_operand.vmem [shape: f32[8,8], index: 3, kind: input, shape index: {}]   ;;  %s785_s4 = inlined_call_operand.vmem [shape: f32[8,1], index: 4, kind: input, shape index: {}]   ;;  %s786_s5 = inlined_call_operand.vmem [shape: f32[16,1], index: 5, kind: input, shape index: {}]   ;;  %s787_s6 = inlined_call_operand.vmem [shape: f32[8,32], index: 6, kind: input, shape index: {}]   ;;  %s788_s7 = inlined_call_operand.vmem [shape: f32[16,32], index: 7, kind: input, shape index: {}]   ;;  %s789_s8 = inlined_call_operand.vmem [shape: f32[1,32], index: 8, kind: input, shape index: {}]   ;;  %s790_s9 = inlined_call_operand.vmem [shape: f32[1,32], index: 9, kind: input, shape index: {}]   ;;  %s791_s10 = inlined_call_operand.<no memory space> [shape: f32[1,1], index: 10, kind: input, shape index: {}]   ;;  %s792_s11 = inlined_call_operand.vmem [shape: f32[8,1], index: 11, kind: output, shape index: {0}]   ;;  %s793_s12 = inlined_call_operand.hbm [shape: f32[1,1], index: 12, kind: output, shape index: {1}]  }
   0x1   :  { %v18_v0 = vstv %s791_s10 }
   0x2   :  { %19 = vst [vmem:[#allocation2] sm:$0x1] %v18_v0 }
   0x3   :  { %v46_v1 = vld [vmem:[%s786_s5] sm:$0xff]  ;;  %vm76_vm0 = vcmask 64512   ;;  %v551_v3 = vmov 0  }
   0x4   :  { %v48_v2 = vld [vmem:[%s787_s6] sm:$0xff]  ;;  %517 = vset.pattern.permute.xlu0 %v551_v3 }
   0x5   :  { %95 = vmatpush.msra.mxu0 %v48_v2  ;;  %v631_v4 = vld [vmem:[%s781_s0] sm:$0xff] }
   0x6   :  { %20 = vsyncpa [#allocation4], 0  ;;  %56 = vperm.xlu0 %517, %v46_v1   ;;  %504 = vmatmul.msk.f32.vlgmr.msra.gmra.mxu0 %vm76_vm0, %v631_v4  ;;  %v47_v5 = vld [vmem:[%s786_s5 + $0x8] sm:$0xff]  ;;  %v49_v7 = vld [vmem:[%s788_s7] sm:$0xff]  ;;  %vm66_vm1 = vcmask 261120   ;;  %vm118_vm3 = vcmask 7168  }
   0x7   :  { %518 = vset.pattern.permute.xlu1 %v551_v3  ;;  %519 = vset.pattern.permute.xlu2 %v551_v3  ;;  %v50_v8 = vld [vmem:[%s788_s7 + $0x8] sm:$0xff]  ;;  %v520_v22 = vld [vmem:[%s789_s8] ss:$0 sm:$0xff]  ;;  %s493_s28 = sshll.u32 %s793_s12, 4  ;;  %vm482_vm7 = vcmask 0   ;;  %s494_s28 = int_to_ptr.hbm [resolvable:$true] %s493_s28 }
   0x8   :  { %v521_v25 = vld [vmem:[%s790_s9] ss:$0 sm:$0xff] }
   0x9   :  { %v522_v29 = vld [vmem:[#allocation2] ss:$0 sm:$0xff] }
   0xa   :  { %v662_v30 = vld [vmem:[%s783_s2] sm:$0xff] }
   0xb   :  { %v668_v37 = vld [vmem:[%s782_s1] sm:$0xff] }
   0xe   :  { %61 = vperm.xlu0 %517, %v47_v5  }
  0x78   :  { %v638_v6 = vpop.permute.xlu0 %56 }
  0x79   :  { %v64_v9 = vmul.f32 %v638_v6, %v49_v7 }
  0x7b   :  { %v67_v12 = vsel %vm66_vm1, %v64_v9, 0.0 }
  0x80   :  { %v647_v10 = vpop.permute.xlu0 %61 }
  0x81   :  { %v65_v11 = vmul.f32 %v647_v10, %v50_v8 }
  0x83   :  { %v68_v13 = vsel %vm66_vm1, %v65_v11, 0.0  ;;  %v97_v20 = vpop.f32.mrf.mxu0 }
  0x84   :  { %v69_v14 = vadd.f32 %v68_v13, %v67_v12  ;;  %v51_v12 = vld [vmem:[%s789_s8] sm:$0x1] }
  0x86   :  { %v70_v15 = vrot.slane %v69_v14, 4 }
  0x88   :  { %v71_v16 = vadd.f32 %v70_v15, %v69_v14 }
  0x8a   :  { %v72_v17 = vrot.slane %v71_v16, 2 }
  0x8c   :  { %v73_v18 = vadd.f32 %v72_v17, %v71_v16  ;;  %v52_v16 = vld [vmem:[%s790_s9] sm:$0x1] }
  0x8e   :  { %v74_v19 = vrot.slane %v73_v18, 1 }
  0x90   :  { %v75_v21 = vadd.f32 %v74_v19, %v73_v18 }
  0x92   :  { %v98_v23 = vadd.f32 %v97_v20, %v75_v21 }
  0x94   :  { %v103_v24 = vadd.f32 %v520_v22, %v98_v23 }
  0x96   :  { %v104_v26 = vmax.f32 %v103_v24, 0.0  ;;  %vm139_vm2 = vcmp.gt.f32.partialorder %v103_v24, 0.0 }
  0x98   :  { %v108_v27 = vmul.f32 %v521_v25, %v104_v26 }
  0x9a   :  { %v109_v28 = vsel %vm66_vm1, %v108_v27, 0.0 }
  0x9b   :  { %110 = vadd.xlane.f32.xlu1 %v109_v28 }
 0x10e   :  { %v111_v31 = vpop.xlane.xlu1 %110 }
 0x10f   :  { %v115_v32 = vadd.f32 %v522_v29, %v111_v31 }
 0x111   :  { %v116_v33 = vsub.f32 %v115_v32, %v662_v30 }
 0x113   :  { %v117_v34 = vmul.f32 0.25, %v116_v33 }
 0x115   :  { %128 = vperm.xlu1 %518, %v117_v34   ;;  %v119_v27 = vsel %vm118_vm3, %v117_v34, 0.0 }
 0x116   :  { %v120_v28 = vrot.slane %v119_v27, 4 }
 0x118   :  { %v121_v29 = vadd.f32 %v120_v28, %v119_v27 }
 0x11a   :  { %v122_v31 = vrot.slane %v121_v29, 2 }
 0x11c   :  { %v123_v32 = vadd.f32 %v122_v31, %v121_v29 }
 0x11e   :  { %v124_v33 = vrot.slane %v123_v32, 1 }
 0x187   :  { %v129_v35 = vpop.permute.xlu1 %128 }
 0x188   :  { %v140_v36 = vmul.f32 %v521_v25, %v129_v35  ;;  %v131_v55 = vmul.f32 %v129_v35, %v104_v26  ;;  %v125_v35 = vadd.f32 %v124_v33, %v123_v32 }
 0x18a   :  { %v141_v38 = vsel %vm139_vm2, %v140_v36, 0.0  ;;  %505 = vmatpush.msk.msra.mxu1 %vm139_vm2, %v140_v36  ;;  %v132_v58 = vsel %vm66_vm1, %v131_v55, 0.0  ;;  %v184_v36 = vmul.f32 0.001, %v125_v35 }
 0x18b   :  { %506 = vmatmul.msk.f32.vlgmr.msra.gmra.mxu1 %vm76_vm0, %v668_v37  ;;  %v142_v42 = vsel %vm66_vm1, %v141_v38, 0.0  ;;  %v133_v61 = vrot.slane %v132_v58, 4  ;;  %v53_v38 = vld [vmem:[#allocation2] sm:$0x1] }
 0x18c   :  { %v143_v43 = vrot.slane %v142_v42, 4 }
 0x18d   :  { %v134_v63 = vadd.f32 %v133_v61, %v132_v58 }
 0x18e   :  { %v144_v44 = vadd.f32 %v143_v43, %v142_v42 }
 0x18f   :  { %v135_v1 = vrot.slane %v134_v63, 2 }
 0x190   :  { %v145_v45 = vrot.slane %v144_v44, 2 }
 0x191   :  { %v136_v3 = vadd.f32 %v135_v1, %v134_v63 }
 0x192   :  { %v146_v46 = vadd.f32 %v145_v45, %v144_v44 }
 0x194   :  { %v147_v47 = vrot.slane %v146_v46, 1 }
 0x196   :  { %v148_v48 = vadd.f32 %v147_v47, %v146_v46 }
 0x198   :  { %v172_v49 = vmul.f32 %v148_v48, %v638_v6  ;;  %v173_v50 = vmul.f32 %v148_v48, %v647_v10  ;;  %v180_v9 = vmul.f32 0.001, %v148_v48 }
 0x19a   :  { %v176_v51 = vmul.f32 0.001, %v172_v49  ;;  %v177_v52 = vmul.f32 0.001, %v173_v50  ;;  %v694_v14 = vsub.f32 %v51_v12, %v180_v9 }
 0x19c   :  { %v680_v53 = vsub.f32 %v49_v7, %v176_v51  ;;  %v682_v54 = vsub.f32 %v50_v8, %v177_v52  ;;  %v137_v7 = vrot.slane %v136_v3, 1  ;;  %v218_v20 = vperm.slane %v694_v14, 0 }
 0x19e   :  { %v186_v56 = vmul.f32 %v680_v53, %v638_v6  ;;  %v187_v57 = vmul.f32 %v682_v54, %v647_v10  ;;  %v138_v11 = vadd.f32 %v137_v7, %v136_v3 }
 0x1a0   :  { %v188_v59 = vsel %vm66_vm1, %v186_v56, 0.0  ;;  %v189_v60 = vsel %vm66_vm1, %v187_v57, 0.0  ;;  %v182_v15 = vmul.f32 0.001, %v138_v11 }
 0x1a1   :  { %v190_v62 = vadd.f32 %v189_v60, %v188_v59 }
 0x1a2   :  { %v700_v21 = vsub.f32 %v52_v16, %v182_v15 }
 0x1a3   :  { %v191_v0 = vrot.slane %v190_v62, 4 }
 0x1a4   :  { %v223_v24 = vperm.slane %v700_v21, 0 }
 0x208   :  { %v169_v39 = vpop.f32.mrf.mxu1 }
 0x209   :  { %v174_v40 = vmul.f32 0.001, %v169_v39  ;;  %v705_v39 = vsub.f32 %v53_v38, %v184_v36 }
 0x20b   :  { %v672_v41 = vsub.f32 %v48_v2, %v174_v40  ;;  %v192_v2 = vadd.f32 %v191_v0, %v190_v62  ;;  %v230_v40 = vperm.slane %v705_v39, 0 }
 0x20d   :  { %212 = vmatpush.msra.mxu2 %v672_v41  ;;  %v193_v5 = vrot.slane %v192_v2, 2 }
 0x20e   :  { %507 = vmatmul.msk.f32.vlgmr.msra.gmra.mxu2 %vm76_vm0, %v631_v4 }
 0x20f   :  { %v194_v8 = vadd.f32 %v193_v5, %v192_v2 }
 0x211   :  { %v195_v13 = vrot.slane %v194_v8, 1 }
 0x213   :  { %v196_v17 = vadd.f32 %v195_v13, %v194_v8 }
 0x291   :  { %v214_v18 = vpop.f32.mrf.mxu2 }
 0x292   :  { %v215_v19 = vadd.f32 %v214_v18, %v196_v17 }
 0x294   :  { %v220_v22 = vadd.f32 %v218_v20, %v215_v19 }
 0x296   :  { %v221_v23 = vmax.f32 %v220_v22, 0.0  ;;  %vm255_vm4 = vcmp.gt.f32.partialorder %v220_v22, 0.0 }
 0x298   :  { %v225_v25 = vmul.f32 %v223_v24, %v221_v23 }
 0x29a   :  { %v226_v26 = vsel %vm66_vm1, %v225_v25, 0.0 }
 0x29b   :  { %227 = vadd.xlane.f32.xlu2 %v226_v26 }
 0x30e   :  { %v228_v42 = vpop.xlane.xlu2 %227 }
 0x30f   :  { %v232_v43 = vadd.f32 %v230_v40, %v228_v42 }
 0x311   :  { %v233_v44 = vsub.f32 %v232_v43, %v662_v30 }
 0x313   :  { %v234_v45 = vmul.f32 0.25, %v233_v44 }
 0x315   :  { %244 = vperm.xlu2 %519, %v234_v45  }
 0x36f   :  { %v245_v46 = vpop.permute.xlu2 %244 }
 0x370   :  { %v256_v34 = vmul.f32 %v245_v46, %v223_v24 }
 0x372   :  { %v257_v47 = vsel %vm255_vm4, %v256_v34, 0.0  ;;  %508 = vmatpush.msk.msra.mxu3 %vm255_vm4, %v256_v34 }
 0x373   :  { %509 = vmatmul.msk.f32.vlgmr.msra.gmra.mxu3 %vm76_vm0, %v668_v37  ;;  %v258_v51 = vsel %vm66_vm1, %v257_v47, 0.0 }
 0x374   :  { %v259_v52 = vrot.slane %v258_v51, 4 }
 0x376   :  { %v260_v55 = vadd.f32 %v259_v52, %v258_v51 }
 0x378   :  { %v261_v56 = vrot.slane %v260_v55, 2 }
 0x37a   :  { %v262_v57 = vadd.f32 %v261_v56, %v260_v55 }
 0x37c   :  { %v263_v58 = vrot.slane %v262_v57, 1 }
 0x37e   :  { %v264_v59 = vadd.f32 %v263_v58, %v262_v57  ;;  %v412_v58 = vld [vmem:[%s784_s3] sm:$0xff] }
 0x380   :  { %v285_v60 = vmul.f32 %v264_v59, %v638_v6  ;;  %v286_v61 = vmul.f32 %v264_v59, %v647_v10  ;;  %v293_v19 = vmul.f32 0.001, %v264_v59 }
 0x382   :  { %v289_v62 = vmul.f32 0.001, %v285_v60  ;;  %v734_v22 = vsub.f32 %v694_v14, %v293_v19  ;;  %v235_v14 = vsel %vm118_vm3, %v234_v45, 0.0 }
 0x383   :  { %v236_v36 = vrot.slane %v235_v14, 4 }
 0x384   :  { %v721_v63 = vsub.f32 %v680_v53, %v289_v62  ;;  %v331_v27 = vperm.slane %v734_v22, 0 }
 0x385   :  { %v237_v38 = vadd.f32 %v236_v36, %v235_v14 }
 0x386   :  { %v299_v1 = vmul.f32 %v721_v63, %v638_v6 }
 0x387   :  { %v238_v40 = vrot.slane %v237_v38, 2 }
 0x388   :  { %v301_v5 = vsel %vm66_vm1, %v299_v1, 0.0 }
 0x389   :  { %v239_v42 = vadd.f32 %v238_v40, %v237_v38 }
 0x38b   :  { %v240_v43 = vrot.slane %v239_v42, 1 }
 0x38d   :  { %v241_v44 = vadd.f32 %v240_v43, %v239_v42 }
 0x3f6   :  { %v282_v48 = vpop.f32.mrf.mxu3 }
 0x3f7   :  { %v287_v49 = vmul.f32 0.001, %v282_v48 }
 0x3f9   :  { %v712_v50 = vsub.f32 %v672_v41, %v287_v49  ;;  %v290_v41 = vmul.f32 0.001, %v286_v61 }
 0x3fb   :  { %325 = vmatpush.msrb.mxu0 %v712_v50  ;;  %v724_v0 = vsub.f32 %v682_v54, %v290_v41 }
 0x3fc   :  { %510 = vmatmul.msk.f32.vlgmr.msrb.gmra.mxu0 %vm76_vm0, %v631_v4  ;;  %v247_v4 = vmul.f32 %v245_v46, %v221_v23  ;;  %v297_v46 = vmul.f32 0.001, %v241_v44 }
 0x3fd   :  { %v300_v2 = vmul.f32 %v724_v0, %v647_v10 }
 0x3fe   :  { %v248_v3 = vsel %vm66_vm1, %v247_v4, 0.0 }
 0x3ff   :  { %v302_v7 = vsel %vm66_vm1, %v300_v2, 0.0  ;;  %v249_v8 = vrot.slane %v248_v3, 4 }
 0x400   :  { %v303_v9 = vadd.f32 %v302_v7, %v301_v5 }
 0x401   :  { %v250_v53 = vadd.f32 %v249_v8, %v248_v3 }
 0x402   :  { %v304_v11 = vrot.slane %v303_v9, 4 }
 0x403   :  { %v251_v12 = vrot.slane %v250_v53, 2 }
 0x404   :  { %v305_v54 = vadd.f32 %v304_v11, %v303_v9 }
 0x405   :  { %v252_v13 = vadd.f32 %v251_v12, %v250_v53 }
 0x406   :  { %v306_v15 = vrot.slane %v305_v54, 2 }
 0x407   :  { %v253_v16 = vrot.slane %v252_v13, 1 }
 0x408   :  { %v307_v17 = vadd.f32 %v306_v15, %v305_v54 }
 0x409   :  { %v254_v18 = vadd.f32 %v253_v16, %v252_v13 }
 0x40a   :  { %v308_v20 = vrot.slane %v307_v17, 1 }
 0x40b   :  { %v295_v23 = vmul.f32 0.001, %v254_v18 }
 0x40c   :  { %v309_v24 = vadd.f32 %v308_v20, %v307_v17 }
 0x40d   :  { %v738_v28 = vsub.f32 %v700_v21, %v295_v23  ;;  %v744_v21 = vsub.f32 %v705_v39, %v297_v46 }
 0x40f   :  { %v336_v32 = vperm.slane %v738_v28, 0  ;;  %v343_v34 = vperm.slane %v744_v21, 0 }
 0x479   :  { %v327_v25 = vpop.f32.mrf.mxu0 }
 0x47a   :  { %v328_v26 = vadd.f32 %v327_v25, %v309_v24 }
 0x47c   :  { %v333_v29 = vadd.f32 %v331_v27, %v328_v26 }
 0x47e   :  { %v334_v31 = vmax.f32 %v333_v29, 0.0  ;;  %vm368_vm5 = vcmp.gt.f32.partialorder %v333_v29, 0.0 }
 0x480   :  { %v338_v33 = vmul.f32 %v336_v32, %v334_v31 }
 0x482   :  { %v339_v35 = vsel %vm66_vm1, %v338_v33, 0.0 }
 0x483   :  { %340 = vadd.xlane.f32.xlu0 %v339_v35 }
 0x4f6   :  { %v341_v47 = vpop.xlane.xlu0 %340 }
 0x4f7   :  { %v345_v48 = vadd.f32 %v343_v34, %v341_v47 }
 0x4f9   :  { %v346_v49 = vsub.f32 %v345_v48, %v662_v30  ;;  %v552_v48 = vmov 8.0  }
 0x4fa   :  { %523 = vrcp.f32 %v552_v48 }
 0x4fb   :  { %v347_v51 = vmul.f32 0.25, %v346_v49 }
 0x4fd   :  { %357 = vperm.xlu2 %519, %v347_v51   ;;  %v348_v40 = vsel %vm118_vm3, %v347_v51, 0.0 }
 0x4fe   :  { %v349_v42 = vrot.slane %v348_v40, 4 }
 0x500   :  { %v350_v43 = vadd.f32 %v349_v42, %v348_v40  ;;  %v524_v49 = vpop.eup %523 }
 0x501   :  { %v475_v51 = vmul.f32 8.0, %v524_v49  ;;  %vm479_vm6 = vweird.f32 %v524_v49 }
 0x502   :  { %v351_v44 = vrot.slane %v350_v43, 2 }
 0x557   :  { %v358_v52 = vpop.permute.xlu2 %357 }
 0x558   :  { %v369_v45 = vmul.f32 %v358_v52, %v336_v32  ;;  %v360_v7 = vmul.f32 %v358_v52, %v334_v31 }
 0x55a   :  { %v370_v55 = vsel %vm368_vm5, %v369_v45, 0.0  ;;  %511 = vmatpush.msk.msrb.mxu1 %vm368_vm5, %v369_v45  ;;  %v361_v53 = vsel %vm66_vm1, %v360_v7, 0.0  ;;  %v463_v45 = vld [vmem:[%s785_s4] sm:$0xff]  ;;  %s553_s4 = smov [#allocation3]  }
 0x55b   :  { %512 = vmatmul.msk.f32.vlgmr.msrb.gmra.mxu1 %vm76_vm0, %v668_v37  ;;  %v371_v30 = vsel %vm66_vm1, %v370_v55, 0.0  ;;  %v362_v54 = vrot.slane %v361_v53, 4  ;;  %s491_s25 = sshll.u32 %s553_s4, 4  ;;  %s492_s25 = int_to_ptr.vmem [resolvable:$true] %s491_s25 }
 0x55c   :  { %v372_v59 = vrot.slane %v371_v30, 4 }
 0x55d   :  { %v363_v15 = vadd.f32 %v362_v54, %v361_v53 }
 0x55e   :  { %v373_v60 = vadd.f32 %v372_v59, %v371_v30 }
 0x55f   :  { %v364_v17 = vrot.slane %v363_v15, 2 }
 0x560   :  { %v374_v61 = vrot.slane %v373_v60, 2 }
 0x562   :  { %v375_v62 = vadd.f32 %v374_v61, %v373_v60 }
 0x564   :  { %v376_v41 = vrot.slane %v375_v62, 1 }
 0x566   :  { %v377_v4 = vadd.f32 %v376_v41, %v375_v62 }
 0x568   :  { %v398_v37 = vmul.f32 %v377_v4, %v638_v6  ;;  %v399_v1 = vmul.f32 %v377_v4, %v647_v10  ;;  %v406_v23 = vmul.f32 0.001, %v377_v4 }
 0x56a   :  { %v403_v2 = vmul.f32 0.001, %v399_v1 }
 0x56c   :  { %v405_v5 = vsub.f32 %v724_v0, %v403_v2 }
 0x56e   :  { %v414_v9 = vmul.f32 %v405_v5, %v647_v10  ;;  %v407_v10 = vsub.f32 %v734_v22, %v406_v23  ;;  %v352_v22 = vadd.f32 %v351_v44, %v350_v43 }
 0x570   :  { %v416_v12 = vsel %vm66_vm1, %v414_v9, 0.0  ;;  %v448_v31 = vperm.slane %v407_v10, 0  ;;  %v353_v46 = vrot.slane %v352_v22, 1 }
 0x572   :  { %v354_v34 = vadd.f32 %v353_v46, %v352_v22 }
 0x574   :  { %v410_v47 = vmul.f32 0.001, %v354_v34 }
 0x5d8   :  { %v395_v56 = vpop.f32.mrf.mxu1 }
 0x5d9   :  { %v400_v57 = vmul.f32 0.001, %v395_v56 }
 0x5db   :  { %v401_v39 = vsub.f32 %v712_v50, %v400_v57  ;;  %v402_v50 = vmul.f32 0.001, %v398_v37 }
 0x5dd   :  { %442 = vmatpush.msrb.mxu2 %v401_v39  ;;  %v404_v3 = vsub.f32 %v721_v63, %v402_v50  ;;  %v365_v63 = vadd.f32 %v364_v17, %v363_v15 }
 0x5de   :  { %513 = vmatmul.msk.f32.vlgmr.msrb.gmra.mxu2 %vm76_vm0, %v412_v58  ;;  %v476_v58 = vsub.f32 1.0, %v475_v51 }
 0x5df   :  { %v413_v8 = vmul.f32 %v404_v3, %v638_v6  ;;  %v366_v0 = vrot.slane %v365_v63, 1 }
 0x5e0   :  { %v477_v59 = vmul.f32 %v524_v49, %v476_v58 }
 0x5e1   :  { %v415_v11 = vsel %vm66_vm1, %v413_v8, 0.0  ;;  %v367_v6 = vadd.f32 %v366_v0, %v365_v63 }
 0x5e2   :  { %v417_v13 = vadd.f32 %v416_v12, %v415_v11  ;;  %v478_v62 = vadd.f32 %v524_v49, %v477_v59 }
 0x5e3   :  { %v408_v25 = vmul.f32 0.001, %v367_v6 }
 0x5e4   :  { %v418_v16 = vrot.slane %v417_v13, 4  ;;  %v480_v37 = vsel %vm479_vm6, %v524_v49, %v478_v62 }
 0x5e5   :  { %v409_v32 = vsub.f32 %v738_v28, %v408_v25  ;;  %v411_v28 = vsub.f32 %v744_v21, %v410_v47 }
 0x5e6   :  { %v419_v18 = vadd.f32 %v418_v16, %v417_v13 }
 0x5e7   :  { %v453_v14 = vperm.slane %v409_v32, 0  ;;  %v460_v52 = vperm.slane %v411_v28, 0 }
 0x5e8   :  { %v420_v19 = vrot.slane %v419_v18, 2 }
 0x5ea   :  { %v421_v20 = vadd.f32 %v420_v19, %v419_v18 }
 0x5ec   :  { %v422_v24 = vrot.slane %v421_v20, 1 }
 0x5ee   :  { %v423_v26 = vadd.f32 %v422_v24, %v421_v20 }
 0x661   :  { %v444_v27 = vpop.f32.mrf.mxu2 }
 0x662   :  { %v445_v29 = vadd.f32 %v444_v27, %v423_v26 }
 0x664   :  { %v450_v33 = vadd.f32 %v448_v31, %v445_v29 }
 0x666   :  { %v451_v35 = vmax.f32 %v450_v33, 0.0 }
 0x668   :  { %v455_v36 = vmul.f32 %v453_v14, %v451_v35 }
 0x66a   :  { %v456_v38 = vsel %vm66_vm1, %v455_v36, 0.0 }
 0x66b   :  { %457 = vadd.xlane.f32.xlu1 %v456_v38 }
 0x6de   :  { %v458_v55 = vpop.xlane.xlu1 %457 }
 0x6df   :  { %v462_v56 = vadd.f32 %v460_v52, %v458_v55 }
 0x6e1   :  { %v464_v57 = vsub.f32 %v462_v56, %v463_v45  ;;  %465 = vst.msk [vmem:[%s792_s11] sm:$0xff] %vm118_vm3, %v462_v56 }
 0x6e3   :  { %v466_v39 = vmul.f32 %v464_v57, %v464_v57 }
 0x6e5   :  { %v467_v30 = vsel %vm118_vm3, %v466_v39, 0.0 }
 0x6e6   :  { %v468_v21 = vrot.slane %v467_v30, 4 }
 0x6e8   :  { %v469_v60 = vadd.f32 %v468_v21, %v467_v30 }
 0x6ea   :  { %v470_v61 = vrot.slane %v469_v60, 2 }
 0x6ec   :  { %v471_v41 = vadd.f32 %v470_v61, %v469_v60 }
 0x6ee   :  { %v472_v4 = vrot.slane %v471_v41, 1 }
 0x6f0   :  { %v473_v1 = vadd.f32 %v472_v4, %v471_v41 }
 0x6f2   :  { %v481_v50 = vmul.f32 %v480_v37, %v473_v1 }
 0x6f4   :  { %483 = vst.msk [vmem:[#allocation3] sm:$0x1] %vm482_vm7, %v481_v50 }
 0x6f5   :  { %496 = dma.vmem_to_hbm [thread:$0]  %s492_s25, 16, %s494_s28, [#allocation4]  }
 0x6f6   :  { %549 = dma.done.wait [#allocation4], 16  }
 0x6f7   :  { %550 = vsyncadd [#allocation4], 4294967280 }
 0x6f8   :  { %503 = vsyncpa [#allocation4], 1 }

// kernel: meta_forward.2
= control target key start
LH: loop header
LB: loop body
LE: loop exit
PB: predicated region body
PF: predicated region fallthrough
CT: control target
= control target key end

     0   :  { %s1491_s0 = inlined_call_operand.vmem [shape: f32[1,16], index: 0, kind: input, shape index: {}]   ;;  %s1492_s1 = inlined_call_operand.vmem [shape: f32[16,16], index: 1, kind: input, shape index: {}]   ;;  %s1493_s2 = inlined_call_operand.vmem [shape: f32[16,16], index: 2, kind: input, shape index: {}]   ;;  %s1494_s3 = inlined_call_operand.vmem [shape: f32[2,16], index: 3, kind: input, shape index: {}]   ;;  %s1495_s4 = inlined_call_operand.vmem [shape: f32[16,32], index: 4, kind: input, shape index: {}]   ;;  %s1496_s5 = inlined_call_operand.vmem [shape: f32[1,32], index: 5, kind: input, shape index: {}]   ;;  %s1497_s6 = inlined_call_operand.vmem [shape: f32[2,16], index: 6, kind: input, shape index: {}]   ;;  %s1498_s7 = inlined_call_operand.vmem [shape: f32[16,32], index: 7, kind: input, shape index: {}]   ;;  %s1499_s8 = inlined_call_operand.vmem [shape: f32[1,32], index: 8, kind: input, shape index: {}]   ;;  %s1500_s9 = inlined_call_operand.vmem [shape: f32[1,16], index: 9, kind: input, shape index: {}]   ;;  %s1501_s10 = inlined_call_operand.hbm [shape: f32[16,16], index: 10, kind: input, shape index: {}]   ;;  %s1502_s11 = inlined_call_operand.vmem [shape: f32[1,16], index: 11, kind: input, shape index: {}]   ;;  %s1503_s12 = inlined_call_operand.hbm [shape: f32[16,896], index: 12, kind: input, shape index: {}]   ;;  %s1504_s13 = inlined_call_operand.hbm [shape: f32[16,896], index: 13, kind: input, shape index: {}]   ;;  %s1505_s14 = inlined_call_operand.hbm [shape: f32[1,896], index: 14, kind: input, shape index: {}]   ;;  %s1506_s15 = inlined_call_operand.vmem [shape: f32[1,896], index: 15, kind: input, shape index: {}]   ;;  %s1507_s16 = inlined_call_operand.vmem [shape: f32[1,896], index: 16, kind: output, shape index: {}]  }
   0x1   :  { %1508 = sst [smem:[#allocation12_spill]] %s1491_s0 }
   0x2   :  { %21 = vsyncpa [#allocation3], 0 }
   0x3   :  { %22 = vsyncpa [#allocation5], 0  ;;  %s63_s23 = sshll.u32 %s1503_s12, 4  ;;  %s64_s23 = int_to_ptr.hbm [resolvable:$true] %s63_s23 }
   0x4   :  { %23 = vsyncpa [#allocation8], 0  ;;  %s1134_s24 = smov [#allocation4]   ;;  %s48_s28 = sshll.u32 %s1501_s10, 4  ;;  %s49_s28 = int_to_ptr.hbm [resolvable:$true] %s48_s28 }
   0x5   :  { %s65_s25 = sshll.u32 %s1134_s24, 4  ;;  %s1135_s29 = smov 896   ;;  %s66_s25 = int_to_ptr.vmem [resolvable:$true] %s65_s25 }
   0x6   :  { %s1136_s30 = smov 56   ;;  %s1137_s0 = smov [#allocation2]  }
   0x7   :  { %71 = dma.hbm_to_vmem [thread:$0]  %s64_s23, 1792, %s66_s25, [#allocation5], %s1135_s29, %s1135_s29, %s1136_s30  }
   0x8   :  { %s50_s17 = sshll.u32 %s1137_s0, 4  ;;  %s1138_s18 = smov 128   ;;  %s51_s17 = int_to_ptr.vmem [resolvable:$true] %s50_s17 }
   0x9   :  { %s1139_s19 = smov 8   ;;  %s76_s21 = sshll.u32 %s1504_s13, 4  ;;  %s77_s21 = int_to_ptr.hbm [resolvable:$true] %s76_s21 }
   0xa   :  { %56 = dma.hbm_to_vmem [thread:$0]  %s49_s28, 256, %s51_s17, [#allocation3], %s1138_s18, %s1138_s18, %s1139_s19  }
   0xb   :  { %s1140_s22 = smov [#allocation6]   ;;  %s90_s27 = sshll.u32 %s1505_s14, 4  ;;  %s91_s27 = int_to_ptr.hbm [resolvable:$true] %s90_s27 }
   0xc   :  { %s78_s24 = sshll.u32 %s1140_s22, 4  ;;  %s1141_s23 = smov [#allocation7]   ;;  %s79_s24 = int_to_ptr.vmem [resolvable:$true] %s78_s24 }
   0xd   :  { %84 = dma.hbm_to_vmem [thread:$0]  %s77_s21, 1792, %s79_s24, [#allocation5], %s1135_s29, %s1135_s29, %s1136_s30  }
   0xe   :  { %s92_s25 = sshll.u32 %s1141_s23, 4  ;;  %s93_s25 = int_to_ptr.vmem [resolvable:$true] %s92_s25 }
   0xf   :  { %95 = dma.hbm_to_vmem [thread:$0]  %s91_s27, 112, %s93_s25, [#allocation8]  }
  0x10   :  { %1128 = dma.done.wait [#allocation3], 256  }
  0x11   :  { %1129 = vsyncadd [#allocation3], 4294967040 }
  0x12   :  { %1130 = dma.done.wait [#allocation5], 3584  }
  0x13   :  { %1131 = vsyncadd [#allocation5], 4294963712 }
  0x14   :  { %1132 = dma.done.wait [#allocation8], 112  }
  0x15   :  { %1133 = vsyncadd [#allocation8], 4294967184  ;;  %v116_v0 = vld [vmem:[%s1492_s1 + $0x8] sm:$0xff]  ;;  %v115_v1 = vld [vmem:[%s1492_s1] sm:$0xff]  ;;  %s1509_s30 = sld [smem:[#allocation12_spill]]  ;;  %vm117_vm0 = vcmask 130048  }
  0x16   :  { %135 = vmatpush.msra.mxu0 %v116_v0  ;;  %v142_v3 = vld [vmem:[%s1493_s2 + $0x8] sm:$0xff]  ;;  %v141_v4 = vld [vmem:[%s1493_s2] sm:$0xff]  ;;  %vm173_vm1 = vcmask 123904   ;;  %vm191_vm4 = vcmask 1041408   ;;  %vm356_vm15 = vcmask 122880  }
  0x17   :  { %160 = vmatpush.msra.mxu1 %v142_v3  ;;  %v168_v5 = vld [vmem:[%s1495_s4 + $0x8] sm:$0xff]  ;;  %v167_v7 = vld [vmem:[%s1495_s4] sm:$0xff] }
  0x18   :  { %136 = vmatpush.msra.mxu0 %v115_v1  ;;  %241 = vmatpush.msra.mxu2 %v168_v5  ;;  %v166_v9 = vld [vmem:[%s1494_s3] sm:$0x3]  ;;  %s1142_s3 = smov 112   ;;  %v261_v49 = vld [vmem:[%s1498_s7 + $0x8] sm:$0xff] }
  0x19   :  { %161 = vmatpush.msra.mxu1 %v141_v4  ;;  %v169_v16 = vld [vmem:[%s1496_s5] sm:$0x1]  ;;  %332 = vmatpush.msra.mxu3 %v261_v49 }
  0x1a   :  { %242 = vmatpush.msra.mxu2 %v167_v7  ;;  %v260_v50 = vld [vmem:[%s1498_s7] sm:$0xff] }
  0x1b   :  { %v114_v2 = vld [vmem:[%s1509_s30] sm:$0x1]  ;;  %333 = vmatpush.msra.mxu3 %v260_v50 }
  0x1c   :  { %945 = vmatmul.msk.f32.vlgmr.msra.gmra.mxu0 %vm117_vm0, %v114_v2  ;;  %v259_v3 = vld [vmem:[%s1497_s6] sm:$0x3] }
  0x99   :  { %v138_v6 = vpop.f32.mrf.mxu0 }
  0x9a   :  { %946 = vmatmul.msk.f32.vlgmr.msra.gmra.mxu1 %vm117_vm0, %v138_v6 }
 0x117   :  { %v1263_v8 = vpop.f32.mrf.mxu1 }
 0x118   :  { %947 = vmatmul.msk.f32.vlgmr.msra.gmra.mxu2 %vm117_vm0, %v1263_v8  ;;  %v170_v10 = vperm.slane %v1263_v8, 0 }
 0x11a   :  { %v171_v11 = vsub.f32 %v166_v9, %v170_v10 }
 0x11c   :  { %v172_v12 = vmul.f32 %v171_v11, %v171_v11  ;;  %v262_v11 = vld [vmem:[%s1499_s8] sm:$0x1] }
 0x11e   :  { %v174_v13 = vsel %vm173_vm1, %v172_v12, 0.0 }
 0x11f   :  { %175 = vadd.xlane.f32.xlu0 %v174_v13 }
 0x192   :  { %v176_v14 = vpop.xlane.xlu0 %175 }
 0x193   :  { %v177_v15 = vadd.f32 1e-12, %v176_v14 }
 0x195   :  { %980 = vrsqrt.f32 %v177_v15  ;;  %vm185_vm2 = vcmp.eq.f32.partialorder %v177_v15, inf  ;;  %v188_v29 = vand.u32 2147483648, %v177_v15  ;;  %vm187_vm3 = vcmp.eq.f32.partialorder %v177_v15, 0.0 }
 0x19b   :  { %v981_v17 = vpop.eup %980  ;;  %v244_v18 = vpop.f32.mrf.mxu2 }
 0x19c   :  { %v179_v19 = vmul.f32 %v981_v17, %v177_v15  ;;  %v245_v20 = vadd.f32 %v244_v18, %v169_v16 }
 0x19e   :  { %982 = vtanh.f32 %v245_v20  ;;  %v180_v21 = vmul.f32 %v981_v17, %v179_v19 }
 0x1a0   :  { %v181_v22 = vmul.f32 0.5, %v180_v21 }
 0x1a2   :  { %v182_v23 = vsub.f32 1.5, %v181_v22 }
 0x1a4   :  { %v983_v24 = vpop.eup %982  ;;  %v183_v25 = vmul.f32 %v981_v17, %v182_v23 }
 0x1a5   :  { %v250_v26 = vrot.slane %v983_v24, 7 }
 0x1a6   :  { %v184_v27 = vmul.f32 %v183_v25, %v177_v15 }
 0x1a7   :  { %251 = vrot.lane.b32.xlu0 %v250_v26, %s1142_s3 }
 0x1a8   :  { %v186_v28 = vsel %vm185_vm2, %v177_v15, %v184_v27 }
 0x1a9   :  { %v189_v30 = vsel %vm187_vm3, %v188_v29, %v186_v28 }
 0x1aa   :  { %v190_v31 = vsub.f32 0.0, %v189_v30 }
 0x1ac   :  { %v192_v32 = vsel %vm191_vm4, %v190_v31, -inf }
 0x1ad   :  { %v193_v33 = vrot.slane %v192_v32, 4 }
 0x1af   :  { %v194_v34 = vmax.f32 %v192_v32, %v193_v33 }
 0x1b1   :  { %v195_v35 = vrot.slane %v194_v34, 2 }
 0x1b3   :  { %v196_v36 = vmax.f32 %v194_v34, %v195_v35 }
 0x1b5   :  { %v197_v37 = vrot.slane %v196_v36, 1 }
 0x1b7   :  { %v198_v38 = vmax.f32 %v196_v36, %v197_v37 }
 0x1b9   :  { %v199_v39 = vsub.f32 %v190_v31, %v198_v38 }
 0x1bb   :  { %v200_v40 = vmul.f32 1.442695, %v199_v39 }
 0x1bd   :  { %984 = vpow2.f32 %v200_v40 }
 0x1c3   :  { %v985_v41 = vpop.eup %984 }
 0x1c4   :  { %v202_v42 = vsel %vm191_vm4, %v985_v41, 0.0 }
 0x1c5   :  { %v203_v43 = vrot.slane %v202_v42, 4 }
 0x1c7   :  { %v204_v44 = vadd.f32 %v203_v43, %v202_v42 }
 0x1c9   :  { %v205_v45 = vrot.slane %v204_v44, 2 }
 0x1cb   :  { %v206_v46 = vadd.f32 %v205_v45, %v204_v44  ;;  %v352_v44 = vld [vmem:[#allocation2 + $0x8] sm:$0xff]  ;;  %v351_v45 = vld [vmem:[#allocation2] sm:$0xff] }
 0x1cc   :  { %410 = vmatpush.msrb.mxu0 %v352_v44 }
 0x1cd   :  { %v207_v47 = vrot.slane %v206_v46, 1 }
 0x1ce   :  { %411 = vmatpush.msrb.mxu0 %v351_v45 }
 0x1cf   :  { %v208_v48 = vadd.f32 %v207_v47, %v206_v46 }
 0x1d1   :  { %986 = vrcp.f32 %v208_v48  ;;  %v220_v56 = vand.u32 2147483648, %v208_v48  ;;  %vm214_vm6 = vweird.f32 %v208_v48  ;;  %v218_v57 = vand.u32 2147483647, %v208_v48 }
 0x1d3   :  { %v221_v59 = vor.u32 1.1754944e-38, %v220_v56  ;;  %vm219_vm8 = vcmp.eq.f32.partialorder %v218_v57, 8.507059e+37 }
 0x1d7   :  { %v987_v51 = vpop.eup %986 }
 0x1d8   :  { %v210_v52 = vmul.f32 %v987_v51, %v208_v48  ;;  %vm215_vm5 = vweird.f32 %v987_v51 }
 0x1d9   :  { %vm216_vm7 = vmor %vm214_vm6, %vm215_vm5 }
 0x1da   :  { %v211_v53 = vsub.f32 1.0, %v210_v52 }
 0x1dc   :  { %v212_v54 = vmul.f32 %v987_v51, %v211_v53 }
 0x1de   :  { %v213_v55 = vadd.f32 %v987_v51, %v212_v54 }
 0x1e0   :  { %v217_v58 = vsel %vm216_vm7, %v987_v51, %v213_v55 }
 0x1e1   :  { %v222_v60 = vsel %vm219_vm8, %v221_v59, %v217_v58 }
 0x1e2   :  { %v223_v61 = vmul.f32 %v985_v41, %v222_v60 }
 0x1e4   :  { %v248_v0 = vmul.f32 %v983_v24, %v223_v61 }
 0x219   :  { %v252_v62 = vpop.permute.xlu0 %251 }
 0x21a   :  { %v254_v63 = vmul.f32 %v252_v62, %v223_v61  ;;  %v350_v61 = vld [vmem:[%s1500_s9] sm:$0x1] }
 0x21c   :  { %v256_v1 = vrot.slane %v254_v63, 1 }
 0x21e   :  { %v258_v2 = vadd.f32 %v256_v1, %v248_v0 }
 0x220   :  { %948 = vmatmul.msk.f32.vlgmr.msra.gmra.mxu3 %vm117_vm0, %v258_v2  ;;  %v263_v4 = vperm.slane %v258_v2, 0 }
 0x222   :  { %v264_v5 = vsub.f32 %v259_v3, %v263_v4 }
 0x224   :  { %v265_v6 = vmul.f32 %v264_v5, %v264_v5 }
 0x226   :  { %v266_v7 = vsel %vm173_vm1, %v265_v6, 0.0 }
 0x227   :  { %267 = vadd.xlane.f32.xlu1 %v266_v7 }
 0x29a   :  { %v268_v9 = vpop.xlane.xlu1 %267 }
 0x29b   :  { %v269_v10 = vadd.f32 1e-12, %v268_v9 }
 0x29d   :  { %988 = vrsqrt.f32 %v269_v10  ;;  %vm277_vm9 = vcmp.eq.f32.partialorder %v269_v10, inf  ;;  %v280_v24 = vand.u32 2147483648, %v269_v10  ;;  %vm279_vm10 = vcmp.eq.f32.partialorder %v269_v10, 0.0 }
 0x2a3   :  { %v989_v12 = vpop.eup %988  ;;  %v335_v13 = vpop.f32.mrf.mxu3 }
 0x2a4   :  { %v271_v14 = vmul.f32 %v989_v12, %v269_v10  ;;  %v336_v15 = vadd.f32 %v335_v13, %v262_v11 }
 0x2a6   :  { %990 = vtanh.f32 %v336_v15  ;;  %v272_v16 = vmul.f32 %v989_v12, %v271_v14  ;;  %v440_v14 = vld [vmem:[#allocation6 + $0x40] sm:$0xff]  ;;  %v439_v15 = vld [vmem:[#allocation6 + $0x38] sm:$0xff] }
 0x2a7   :  { %483 = vmatpush.msrb.mxu2 %v440_v14  ;;  %463 = vmatpush.msrb.mxu1 %v439_v15 }
 0x2a8   :  { %v273_v17 = vmul.f32 0.5, %v272_v16  ;;  %v441_v16 = vld [vmem:[#allocation6 + $0x48] sm:$0xff] }
 0x2a9   :  { %503 = vmatpush.msrb.mxu3 %v441_v16 }
 0x2aa   :  { %v274_v18 = vsub.f32 1.5, %v273_v17 }
 0x2ac   :  { %v991_v19 = vpop.eup %990  ;;  %v275_v20 = vmul.f32 %v989_v12, %v274_v18  ;;  %v442_v18 = vld [vmem:[#allocation6 + $0x50] sm:$0xff] }
 0x2ad   :  { %v341_v21 = vrot.slane %v991_v19, 7  ;;  %523 = vmatpush.msra.mxu0 %v442_v18 }
 0x2ae   :  { %v276_v22 = vmul.f32 %v275_v20, %v269_v10  ;;  %v433_v20 = vld [vmem:[#allocation6 + $0x8] sm:$0xff] }
 0x2af   :  { %342 = vrot.lane.b32.xlu1 %v341_v21, %s1142_s3  ;;  %v432_v21 = vld [vmem:[#allocation6] sm:$0xff]  ;;  %484 = vmatpush.msrb.mxu2 %v433_v20 }
 0x2b0   :  { %v278_v23 = vsel %vm277_vm9, %v269_v10, %v276_v22  ;;  %v434_v22 = vld [vmem:[#allocation6 + $0x10] sm:$0xff]  ;;  %464 = vmatpush.msrb.mxu1 %v432_v21 }
 0x2b1   :  { %v281_v25 = vsel %vm279_vm10, %v280_v24, %v278_v23  ;;  %v435_v23 = vld [vmem:[#allocation6 + $0x18] sm:$0xff]  ;;  %504 = vmatpush.msrb.mxu3 %v434_v22 }
 0x2b2   :  { %v282_v26 = vsub.f32 0.0, %v281_v25  ;;  %524 = vmatpush.msra.mxu0 %v435_v23  ;;  %v444_v25 = vld [vmem:[#allocation6 + $0x60] sm:$0xff] }
 0x2b3   :  { %563 = vmatpush.msra.mxu2 %v444_v25 }
 0x2b4   :  { %v283_v27 = vsel %vm191_vm4, %v282_v26, -inf }
 0x2b5   :  { %v284_v28 = vrot.slane %v283_v27, 4 }
 0x2b7   :  { %v285_v29 = vmax.f32 %v283_v27, %v284_v28  ;;  %v443_v27 = vld [vmem:[#allocation6 + $0x58] sm:$0xff] }
 0x2b8   :  { %543 = vmatpush.msra.mxu1 %v443_v27 }
 0x2b9   :  { %v286_v30 = vrot.slane %v285_v29, 2 }
 0x2bb   :  { %v287_v31 = vmax.f32 %v285_v29, %v286_v30  ;;  %v445_v29 = vld [vmem:[#allocation6 + $0x68] sm:$0xff] }
 0x2bc   :  { %v425_v30 = vld [vmem:[#allocation4 + $0x38] sm:$0xff]  ;;  %583 = vmatpush.msra.mxu3 %v445_v29 }
 0x2bd   :  { %v288_v32 = vrot.slane %v287_v31, 1 }
 0x2bf   :  { %v289_v33 = vmax.f32 %v287_v31, %v288_v32  ;;  %v436_v31 = vld [vmem:[#allocation6 + $0x20] sm:$0xff]  ;;  %v438_v32 = vld [vmem:[#allocation6 + $0x30] sm:$0xff] }
 0x2c0   :  { %544 = vmatpush.msra.mxu1 %v436_v31  ;;  %584 = vmatpush.msra.mxu3 %v438_v32 }
 0x2c1   :  { %v290_v34 = vsub.f32 %v282_v26, %v289_v33  ;;  %v437_v26 = vld [vmem:[#allocation6 + $0x28] sm:$0xff]  ;;  %v418_v33 = vld [vmem:[#allocation4] sm:$0xff] }
 0x2c2   :  { %564 = vmatpush.msra.mxu2 %v437_v26 }
 0x2c3   :  { %v291_v35 = vmul.f32 1.442695, %v290_v34 }
 0x2c5   :  { %992 = vpow2.f32 %v291_v35  ;;  %v353_v35 = vld [vmem:[%s1502_s11] sm:$0x1] }
 0x2cb   :  { %v993_v36 = vpop.eup %992 }
 0x2cc   :  { %v293_v37 = vsel %vm191_vm4, %v993_v36, 0.0 }
 0x2cd   :  { %v294_v38 = vrot.slane %v293_v37, 4 }
 0x2cf   :  { %v295_v39 = vadd.f32 %v294_v38, %v293_v37 }
 0x2d1   :  { %v296_v40 = vrot.slane %v295_v39, 2 }
 0x2d3   :  { %v297_v41 = vadd.f32 %v296_v40, %v295_v39 }
 0x2d5   :  { %v298_v42 = vrot.slane %v297_v41, 1 }
 0x2d7   :  { %v299_v43 = vadd.f32 %v298_v42, %v297_v41 }
 0x2d9   :  { %994 = vrcp.f32 %v299_v43  ;;  %v311_v51 = vand.u32 2147483648, %v299_v43  ;;  %vm305_vm12 = vweird.f32 %v299_v43  ;;  %v309_v52 = vand.u32 2147483647, %v299_v43 }
 0x2db   :  { %v312_v54 = vor.u32 1.1754944e-38, %v311_v51  ;;  %vm310_vm14 = vcmp.eq.f32.partialorder %v309_v52, 8.507059e+37  ;;  %v427_v51 = vld [vmem:[#allocation4 + $0x48] sm:$0xff]  ;;  %v426_v52 = vld [vmem:[#allocation4 + $0x40] sm:$0xff] }
 0x2df   :  { %v995_v46 = vpop.eup %994 }
 0x2e0   :  { %v301_v47 = vmul.f32 %v995_v46, %v299_v43  ;;  %vm306_vm11 = vweird.f32 %v995_v46 }
 0x2e1   :  { %vm307_vm13 = vmor %vm305_vm12, %vm306_vm11 }
 0x2e2   :  { %v302_v48 = vsub.f32 1.0, %v301_v47 }
 0x2e4   :  { %v303_v49 = vmul.f32 %v995_v46, %v302_v48 }
 0x2e6   :  { %v304_v50 = vadd.f32 %v995_v46, %v303_v49 }
 0x2e8   :  { %v308_v53 = vsel %vm307_vm13, %v995_v46, %v304_v50 }
 0x2e9   :  { %v313_v55 = vsel %vm310_vm14, %v312_v54, %v308_v53  ;;  %v428_v53 = vld [vmem:[#allocation4 + $0x50] sm:$0xff]  ;;  %v429_v54 = vld [vmem:[#allocation4 + $0x58] sm:$0xff] }
 0x2ea   :  { %v314_v56 = vmul.f32 %v993_v36, %v313_v55  ;;  %v420_v55 = vld [vmem:[#allocation4 + $0x10] sm:$0xff] }
 0x2ec   :  { %v339_v59 = vmul.f32 %v991_v19, %v314_v56 }
 0x321   :  { %v343_v57 = vpop.permute.xlu1 %342 }
 0x322   :  { %v345_v58 = vmul.f32 %v343_v57, %v314_v56  ;;  %v419_v56 = vld [vmem:[#allocation4 + $0x8] sm:$0xff]  ;;  %v421_v57 = vld [vmem:[#allocation4 + $0x18] sm:$0xff] }
 0x324   :  { %v347_v60 = vrot.slane %v345_v58, 1  ;;  %v422_v58 = vld [vmem:[#allocation4 + $0x20] sm:$0xff] }
 0x326   :  { %v349_v62 = vadd.f32 %v347_v60, %v339_v59  ;;  %v431_v59 = vld [vmem:[#allocation4 + $0x68] sm:$0xff]  ;;  %v430_v60 = vld [vmem:[#allocation4 + $0x60] sm:$0xff] }
 0x328   :  { %949 = vmatmul.msk.f32.vlgmr.msrb.gmra.mxu0 %vm117_vm0, %v349_v62  ;;  %v354_v63 = vsub.f32 %v350_v61, %v349_v62  ;;  %v424_v61 = vld [vmem:[#allocation4 + $0x30] sm:$0xff]  ;;  %v423_v62 = vld [vmem:[#allocation4 + $0x28] sm:$0xff] }
 0x329   :  { %603 = vmatpush.msrb.mxu0 %v425_v30 }
 0x32a   :  { %v355_v0 = vmul.f32 %v354_v63, %v354_v63 }
 0x32b   :  { %604 = vmatpush.msrb.mxu0 %v418_v33 }
 0x32c   :  { %v357_v1 = vsel %vm356_vm15, %v355_v0, 0.0 }
 0x32d   :  { %358 = vadd.xlane.f32.xlu2 %v357_v1  ;;  %v729_v1 = vld [vmem:[#allocation7] sm:$0xff] }
 0x32e   :  { %v735_v15 = vperm.slane %v729_v1, 4  ;;  %v733_v23 = vperm.slane %v729_v1, 2  ;;  %v736_v29 = vperm.slane %v729_v1, 5 }
 0x3a0   :  { %v359_v2 = vpop.xlane.xlu2 %358 }
 0x3a1   :  { %v360_v3 = vadd.f32 1e-12, %v359_v2 }
 0x3a3   :  { %996 = vrsqrt.f32 %v360_v3  ;;  %vm368_vm1 = vcmp.eq.f32.partialorder %v360_v3, inf  ;;  %v371_v12 = vand.u32 2147483648, %v360_v3  ;;  %vm370_vm2 = vcmp.eq.f32.partialorder %v360_v3, 0.0 }
 0x3a5   :  { %v413_v36 = vpop.f32.mrf.mxu0 }
 0x3a6   :  { %v414_v39 = vadd.f32 %v413_v36, %v353_v35 }
 0x3a9   :  { %v997_v4 = vpop.eup %996 }
 0x3aa   :  { %v362_v5 = vmul.f32 %v997_v4, %v360_v3 }
 0x3ac   :  { %v363_v6 = vmul.f32 %v997_v4, %v362_v5  ;;  %v731_v5 = vperm.slane %v729_v1, 0 }
 0x3ae   :  { %v364_v7 = vmul.f32 0.5, %v363_v6 }
 0x3b0   :  { %v365_v9 = vsub.f32 1.5, %v364_v7 }
 0x3b2   :  { %v366_v10 = vmul.f32 %v997_v4, %v365_v9 }
 0x3b4   :  { %v367_v11 = vmul.f32 %v366_v10, %v360_v3 }
 0x3b6   :  { %v369_v13 = vsel %vm368_vm1, %v360_v3, %v367_v11 }
 0x3b7   :  { %v372_v17 = vsel %vm370_vm2, %v371_v12, %v369_v13  ;;  %v732_v13 = vperm.slane %v729_v1, 1 }
 0x3b8   :  { %v373_v19 = vsub.f32 0.0, %v372_v17 }
 0x3ba   :  { %v374_v24 = vsub.f32 %v373_v19, %v373_v19 }
 0x3bc   :  { %v375_v28 = vmul.f32 1.442695, %v374_v24  ;;  %v734_v24 = vperm.slane %v729_v1, 3 }
 0x3be   :  { %998 = vpow2.f32 %v375_v28 }
 0x3c4   :  { %v999_v34 = vpop.eup %998 }
 0x3c5   :  { %1000 = vrcp.f32 %v999_v34  ;;  %v389_v41 = vand.u32 2147483648, %v999_v34  ;;  %v387_v43 = vand.u32 2147483647, %v999_v34  ;;  %vm383_vm5 = vweird.f32 %v999_v34 }
 0x3c6   :  { %1002 = vtanh.f32 %v414_v39 }
 0x3c7   :  { %v390_v45 = vor.u32 1.1754944e-38, %v389_v41  ;;  %vm388_vm7 = vcmp.eq.f32.partialorder %v387_v43, 8.507059e+37 }
 0x3cb   :  { %v1001_v37 = vpop.eup %1000 }
 0x3cc   :  { %v379_v38 = vmul.f32 %v1001_v37, %v999_v34  ;;  %vm384_vm3 = vweird.f32 %v1001_v37  ;;  %v1003_v49 = vpop.eup %1002 }
 0x3cd   :  { %vm385_vm6 = vmor %vm383_vm5, %vm384_vm3 }
 0x3ce   :  { %v380_v40 = vsub.f32 1.0, %v379_v38 }
 0x3d0   :  { %v381_v42 = vmul.f32 %v1001_v37, %v380_v40 }
 0x3d2   :  { %v382_v44 = vadd.f32 %v1001_v37, %v381_v42 }
 0x3d4   :  { %v386_v46 = vsel %vm385_vm6, %v1001_v37, %v382_v44 }
 0x3d5   :  { %v391_v47 = vsel %vm388_vm7, %v390_v45, %v386_v46  ;;  %v737_v45 = vperm.slane %v729_v1, 6 }
 0x3d6   :  { %v392_v48 = vmul.f32 %v999_v34, %v391_v47 }
 0x3d8   :  { %v417_v50 = vmul.f32 %v1003_v49, %v392_v48 }
 0x3da   :  { %950 = vmatmul.msk.f32.vlgmr.msrb.gmra.mxu1 %vm117_vm0, %v417_v50  ;;  %951 = vmatmul.msk.f32.vlgmr.msrb.gmra.mxu2 %vm117_vm0, %v417_v50 }
 0x3db   :  { %952 = vmatmul.msk.f32.vlgmr.msrb.gmra.mxu3 %vm117_vm0, %v417_v50  ;;  %953 = vmatmul.msk.f32.vlgmr.msra.gmra.mxu0 %vm117_vm0, %v417_v50 }
 0x3dc   :  { %643 = vmatpush.msrb.mxu2 %v427_v51  ;;  %623 = vmatpush.msrb.mxu1 %v426_v52 }
 0x3dd   :  { %663 = vmatpush.msrb.mxu3 %v428_v53  ;;  %683 = vmatpush.msra.mxu0 %v429_v54 }
 0x3de   :  { %644 = vmatpush.msrb.mxu2 %v420_v55  ;;  %624 = vmatpush.msrb.mxu1 %v419_v56  ;;  %v1347_v56 = vld [vmem:[%s1506_s15] sm:$0xff] }
 0x3df   :  { %664 = vmatpush.msrb.mxu3 %v421_v57  ;;  %684 = vmatpush.msra.mxu0 %v422_v58 }
 0x3e2   :  { %954 = vmatmul.msk.f32.vlgmr.msra.gmra.mxu1 %vm117_vm0, %v417_v50  ;;  %955 = vmatmul.msk.f32.vlgmr.msra.gmra.mxu2 %vm117_vm0, %v417_v50 }
 0x3e3   :  { %956 = vmatmul.msk.f32.vlgmr.msra.gmra.mxu3 %vm117_vm0, %v417_v50  ;;  %957 = vmatmul.msk.f32.vlgmr.msrb.gmra.mxu0 %vm117_vm0, %v1263_v8 }
 0x3e4   :  { %723 = vmatpush.msra.mxu2 %v431_v59  ;;  %703 = vmatpush.msra.mxu1 %v430_v60 }
 0x3e6   :  { %724 = vmatpush.msra.mxu2 %v424_v61  ;;  %704 = vmatpush.msra.mxu1 %v423_v62  ;;  %v887_v62 = vperm.slane %v1347_v56, 0 }
 0x3ea   :  { %958 = vmatmul.msk.f32.vlgmr.msrb.gmra.mxu1 %vm117_vm0, %v1263_v8  ;;  %959 = vmatmul.msk.f32.vlgmr.msrb.gmra.mxu2 %vm117_vm0, %v1263_v8 }
 0x3eb   :  { %960 = vmatmul.msk.f32.vlgmr.msrb.gmra.mxu3 %vm117_vm0, %v1263_v8  ;;  %961 = vmatmul.msk.f32.vlgmr.msra.gmra.mxu0 %vm117_vm0, %v1263_v8 }
 0x3f2   :  { %962 = vmatmul.msk.f32.vlgmr.msra.gmra.mxu1 %vm117_vm0, %v1263_v8  ;;  %963 = vmatmul.msk.f32.vlgmr.msra.gmra.mxu2 %vm117_vm0, %v1263_v8 }
 0x457   :  { %v466_v63 = vpop.f32.mrf.mxu1 }
 0x458   :  { %v526_v0 = vpop.f32.mrf.mxu0 }
 0x45d   :  { %v486_v2 = vpop.f32.mrf.mxu2 }
 0x45e   :  { %v506_v3 = vpop.f32.mrf.mxu3 }
 0x45f   :  { %v546_v4 = vpop.f32.mrf.mxu1 }
 0x460   :  { %v606_v6 = vpop.f32.mrf.mxu0 }
 0x461   :  { %v607_v7 = vadd.f32 %v606_v6, %v466_v63  ;;  %v888_v63 = vperm.slane %v1347_v56, 1 }
 0x463   :  { %v745_v9 = vadd.f32 %v731_v5, %v607_v7 }
 0x465   :  { %v566_v10 = vpop.f32.mrf.mxu2  ;;  %v964_v11 = vmul.f32 -1.442695, %v745_v9 }
 0x466   :  { %v586_v12 = vpop.f32.mrf.mxu3 }
 0x467   :  { %v626_v14 = vpop.f32.mrf.mxu1  ;;  %1004 = vpow2.f32 %v964_v11 }
 0x468   :  { %v627_v16 = vadd.f32 %v626_v14, %v486_v2  ;;  %v686_v17 = vpop.f32.mrf.mxu0  ;;  %v889_v2 = vperm.slane %v1347_v56, 2 }
 0x469   :  { %v687_v18 = vadd.f32 %v686_v17, %v546_v4 }
 0x46a   :  { %v746_v8 = vadd.f32 %v732_v13, %v627_v16 }
 0x46b   :  { %v749_v19 = vadd.f32 %v735_v15, %v687_v18  ;;  %v892_v15 = vperm.slane %v1347_v56, 5 }
 0x46c   :  { %v965_v20 = vmul.f32 -1.442695, %v746_v8 }
 0x46d   :  { %v968_v21 = vmul.f32 -1.442695, %v749_v19  ;;  %v646_v22 = vpop.f32.mrf.mxu2  ;;  %v1005_v30 = vpop.eup %1004 }
 0x46e   :  { %1006 = vpow2.f32 %v965_v20  ;;  %v647_v25 = vadd.f32 %v646_v22, %v506_v3  ;;  %v666_v26 = vpop.f32.mrf.mxu3  ;;  %v1323_v34 = vadd.f32 1.0, %v1005_v30 }
 0x46f   :  { %1008 = vpow2.f32 %v968_v21  ;;  %v667_v27 = vadd.f32 %v666_v26, %v526_v0  ;;  %v706_v28 = vpop.f32.mrf.mxu1  ;;  %v891_v0 = vperm.slane %v1347_v56, 4 }
 0x470   :  { %v747_v31 = vadd.f32 %v733_v23, %v647_v25  ;;  %v707_v33 = vadd.f32 %v706_v28, %v566_v10  ;;  %v789_v5 = vand.u32 2147483647, %v1323_v34  ;;  %v791_v6 = vand.u32 2147483648, %v1323_v34 }
 0x471   :  { %v748_v32 = vadd.f32 %v734_v24, %v667_v27  ;;  %vm785_vm15 = vweird.f32 %v1323_v34 }
 0x472   :  { %v966_v35 = vmul.f32 -1.442695, %v747_v31  ;;  %v750_v37 = vadd.f32 %v736_v29, %v707_v33 }
 0x473   :  { %v967_v36 = vmul.f32 -1.442695, %v748_v32 }
 0x474   :  { %v1007_v38 = vpop.eup %1006  ;;  %1010 = vpow2.f32 %v966_v35  ;;  %v969_v43 = vmul.f32 -1.442695, %v750_v37 }
 0x475   :  { %v1009_v39 = vpop.eup %1008  ;;  %v1325_v40 = vadd.f32 1.0, %v1007_v38  ;;  %v726_v41 = vpop.f32.mrf.mxu2  ;;  %1012 = vpow2.f32 %v967_v36 }
 0x476   :  { %v1327_v42 = vadd.f32 1.0, %v1009_v39  ;;  %1014 = vrcp.f32 %v1323_v34  ;;  %v727_v44 = vadd.f32 %v726_v41, %v586_v12  ;;  %v890_v12 = vperm.slane %v1347_v56, 3 }
 0x477   :  { %1016 = vrcp.f32 %v1325_v40  ;;  %vm800_vm0 = vweird.f32 %v1325_v40  ;;  %v804_v13 = vand.u32 2147483647, %v1325_v40  ;;  %v806_v14 = vand.u32 2147483648, %v1325_v40 }
 0x478   :  { %1018 = vrcp.f32 %v1327_v42  ;;  %v751_v47 = vadd.f32 %v737_v45, %v727_v44  ;;  %vm845_vm8 = vweird.f32 %v1327_v42  ;;  %v849_v17 = vand.u32 2147483647, %v1327_v42 }
 0x479   :  { %1020 = vpow2.f32 %v969_v43  ;;  %v851_v18 = vand.u32 2147483648, %v1327_v42  ;;  %vm1391_vm13 = vcmp.eq.f32.partialorder %v804_v13, 8.507059e+37 }
 0x47a   :  { %v1011_v46 = vpop.eup %1010  ;;  %v970_v54 = vmul.f32 -1.442695, %v751_v47 }
 0x47b   :  { %v1013_v48 = vpop.eup %1012  ;;  %v1332_v49 = vadd.f32 1.0, %v1011_v46 }
 0x47c   :  { %v1334_v50 = vpop.eup %1014  ;;  %v1336_v51 = vadd.f32 1.0, %v1013_v48  ;;  %v807_v48 = vor.u32 1.1754944e-38, %v806_v14 }
 0x47d   :  { %v1338_v52 = vpop.eup %1016  ;;  %1022 = vrcp.f32 %v1332_v49  ;;  %v781_v57 = vmul.f32 %v1334_v50, %v1323_v34  ;;  %vm815_vm10 = vweird.f32 %v1332_v49  ;;  %vm786_vm12 = vweird.f32 %v1334_v50 }
 0x47e   :  { %v1341_v53 = vpop.eup %1018  ;;  %1024 = vrcp.f32 %v1336_v51  ;;  %v796_v58 = vmul.f32 %v1338_v52, %v1325_v40  ;;  %vm801_vm9 = vweird.f32 %v1338_v52  ;;  %v819_v29 = vand.u32 2147483647, %v1332_v49 }
 0x47f   :  { %v1021_v55 = vpop.eup %1020  ;;  %v841_v59 = vmul.f32 %v1341_v53, %v1327_v42  ;;  %1026 = vpow2.f32 %v970_v54  ;;  %v782_v4 = vsub.f32 1.0, %v781_v57  ;;  %v821_v30 = vand.u32 2147483648, %v1332_v49  ;;  %vm1433_vm7 = vmor %vm800_vm0, %vm801_vm9 }
 0x480   :  { %v1355_v60 = vadd.f32 1.0, %v1021_v55  ;;  %v797_v7 = vsub.f32 1.0, %v796_v58  ;;  %v836_v32 = vand.u32 2147483648, %v1336_v51  ;;  %vm830_vm2 = vweird.f32 %v1336_v51 }
 0x481   :  { %v842_v9 = vsub.f32 1.0, %v841_v59  ;;  %v783_v20 = vmul.f32 %v1334_v50, %v782_v4  ;;  %v834_v36 = vand.u32 2147483647, %v1336_v51  ;;  %vm846_vm3 = vweird.f32 %v1341_v53 }
 0x482   :  { %1028 = vrcp.f32 %v1355_v60  ;;  %v798_v21 = vmul.f32 %v1338_v52, %v797_v7  ;;  %v864_v41 = vand.u32 2147483647, %v1355_v60  ;;  %v866_v43 = vand.u32 2147483648, %v1355_v60 }
 0x483   :  { %v1357_v61 = vpop.eup %1022  ;;  %v843_v24 = vmul.f32 %v1341_v53, %v842_v9  ;;  %vm835_vm0 = vcmp.eq.f32.partialorder %v834_v36, 8.507059e+37  ;;  %vm860_vm9 = vweird.f32 %v1355_v60  ;;  %v852_v7 = vor.u32 1.1754944e-38, %v851_v18 }
 0x484   :  { %v811_v1 = vmul.f32 %v1357_v61, %v1332_v49  ;;  %v1366_v3 = vpop.eup %1024  ;;  %vm816_vm11 = vweird.f32 %v1357_v61  ;;  %v799_v33 = vadd.f32 %v1338_v52, %v798_v21  ;;  %v822_v49 = vor.u32 1.1754944e-38, %v821_v30 }
 0x485   :  { %v826_v11 = vmul.f32 %v1366_v3, %v1336_v51  ;;  %v1027_v16 = vpop.eup %1026  ;;  %vm831_vm14 = vweird.f32 %v1366_v3  ;;  %vm1407_vm1 = vmor %vm815_vm10, %vm816_vm11  ;;  %v844_v38 = vadd.f32 %v1341_v53, %v843_v24  ;;  %vm820_vm10 = vcmp.eq.f32.partialorder %v819_v29, 8.507059e+37 }
 0x486   :  { %v812_v10 = vsub.f32 1.0, %v811_v1  ;;  %v1384_v22 = vadd.f32 1.0, %v1027_v16  ;;  %vm1417_vm5 = vmor %vm830_vm2, %vm831_vm14  ;;  %v837_v51 = vor.u32 1.1754944e-38, %v836_v32  ;;  %v803_v55 = vsel %vm1433_vm7, %v1338_v52, %v799_v33 }
 0x487   :  { %v827_v19 = vsub.f32 1.0, %v826_v11  ;;  %vm1444_vm11 = vmor %vm845_vm8, %vm846_vm3  ;;  %v784_v52 = vadd.f32 %v1334_v50, %v783_v20  ;;  %vm865_vm8 = vcmp.eq.f32.partialorder %v864_v41, 8.507059e+37  ;;  %v808_v4 = vsel %vm1391_vm13, %v807_v48, %v803_v55 }
 0x488   :  { %v813_v8 = vmul.f32 %v1357_v61, %v812_v10  ;;  %v1029_v23 = vpop.eup %1028  ;;  %1030 = vrcp.f32 %v1384_v22  ;;  %v848_v42 = vsel %vm1444_vm11, %v1341_v53, %v844_v38  ;;  %v881_v13 = vand.u32 2147483648, %v1384_v22  ;;  %vm1465_vm2 = vmor %vm785_vm15, %vm786_vm12 }
 0x489   :  { %v828_v25 = vmul.f32 %v1366_v3, %v827_v19  ;;  %v856_v28 = vmul.f32 %v1029_v23, %v1355_v60  ;;  %vm861_vm6 = vweird.f32 %v1029_v23  ;;  %vm790_vm3 = vcmp.eq.f32.partialorder %v789_v5, 8.507059e+37 }
 0x48a   :  { %v814_v27 = vadd.f32 %v1357_v61, %v813_v8  ;;  %vm862_vm14 = vmor %vm860_vm9, %vm861_vm6  ;;  %v792_v8 = vor.u32 1.1754944e-38, %v791_v6  ;;  %vm875_vm12 = vweird.f32 %v1384_v22  ;;  %v893_v20 = vperm.slane %v1347_v56, 6 }
 0x48b   :  { %v829_v31 = vadd.f32 %v1366_v3, %v828_v25  ;;  %v857_v37 = vsub.f32 1.0, %v856_v28  ;;  %v882_v5 = vor.u32 1.1754944e-38, %v881_v13  ;;  %v933_v6 = vlaneseq }
 0x48c   :  { %v818_v44 = vsel %vm1407_vm1, %v1357_v61, %v814_v27  ;;  %v867_v61 = vor.u32 1.1754944e-38, %v866_v43  ;;  %vm850_vm1 = vcmp.eq.f32.partialorder %v849_v17, 8.507059e+37  ;;  %v879_v17 = vand.u32 2147483647, %v1384_v22 }
 0x48d   :  { %v833_v45 = vsel %vm1417_vm5, %v1366_v3, %v829_v31  ;;  %v858_v46 = vmul.f32 %v1029_v23, %v857_v37  ;;  %v823_v58 = vsel %vm820_vm10, %v822_v49, %v818_v44  ;;  %v853_v14 = vsel %vm850_vm1, %v852_v7, %v848_v42 }
 0x48e   :  { %v1031_v54 = vpop.eup %1030  ;;  %v838_v59 = vsel %vm835_vm0, %v837_v51, %v833_v45  ;;  %v903_v10 = vmul.f32 %v889_v2, %v823_v58  ;;  %v788_v2 = vsel %vm1465_vm2, %v1334_v50, %v784_v52  ;;  %v905_v50 = vmul.f32 %v891_v0, %v853_v14 }
 0x48f   :  { %v859_v40 = vadd.f32 %v1029_v23, %v858_v46  ;;  %v871_v1 = vmul.f32 %v1031_v54, %v1384_v22  ;;  %v904_v11 = vmul.f32 %v890_v12, %v838_v59  ;;  %vm876_vm13 = vweird.f32 %v1031_v54 }
 0x490   :  { %v902_v12 = vmul.f32 %v888_v63, %v808_v4  ;;  %v916_v21 = vrot.slane %v903_v10, 6  ;;  %vm877_vm15 = vmor %vm875_vm12, %vm876_vm13  ;;  %v793_v24 = vsel %vm790_vm3, %v792_v8, %v788_v2  ;;  %vm923_vm5 = vcmask 1042434  }
 0x491   :  { %v863_v3 = vsel %vm862_vm14, %v1029_v23, %v859_v40  ;;  %v872_v60 = vsub.f32 1.0, %v871_v1  ;;  %v917_v23 = vrot.slane %v904_v11, 5  ;;  %vm880_vm6 = vcmp.eq.f32.partialorder %v879_v17, 8.507059e+37 }
 0x492   :  { %v868_v9 = vsel %vm865_vm8, %v867_v61, %v863_v3  ;;  %vm921_vm7 = vcmask 1040384   ;;  %vm926_vm10 = vcmask 1044484   ;;  %v901_v26 = vmul.f32 %v887_v62, %v793_v24 }
 0x493   :  { %v873_v16 = vmul.f32 %v1031_v54, %v872_v60  ;;  %v906_v18 = vmul.f32 %v892_v15, %v868_v9  ;;  %v915_v15 = vrot.slane %v902_v12, 7  ;;  %v918_v27 = vrot.slane %v905_v50, 4 }
 0x494   :  { %v924_v0 = vsel %vm923_vm5, %v916_v21, %v917_v23  ;;  %vm928_vm11 = vcmask 1045508   ;;  %vm930_vm0 = vcmask 1043456   ;;  %vm935_vm9 = vcmp.lt.s32.totalorder %v933_v6, 896 }
 0x495   :  { %v874_v19 = vadd.f32 %v1031_v54, %v873_v16  ;;  %v919_v25 = vrot.slane %v906_v18, 3  ;;  %v922_v29 = vsel %vm921_vm7, %v901_v26, %v915_v15 }
 0x496   :  { %v925_v31 = vsel %vm191_vm4, %v922_v29, %v924_v0 }
 0x497   :  { %v878_v63 = vsel %vm877_vm15, %v1031_v54, %v874_v19  ;;  %v927_v30 = vsel %vm926_vm10, %v918_v27, %v919_v25 }
 0x498   :  { %v883_v34 = vsel %vm880_vm6, %v882_v5, %v878_v63 }
 0x499   :  { %v907_v22 = vmul.f32 %v893_v20, %v883_v34 }
 0x49b   :  { %v920_v28 = vrot.slane %v907_v22, 2 }
 0x49d   :  { %v929_v32 = vsel %vm928_vm11, %v927_v30, %v920_v28 }
 0x49e   :  { %v931_v33 = vsel %vm930_vm0, %v925_v31, %v929_v32 }
 0x49f   :  { %937 = vst.msk [vmem:[%s1507_s16] sm:$0x7f] %vm935_vm9, %v931_v33 }
 0x4a0   :  { %942 = vsyncpa [#allocation3], 1 }
 0x4a1   :  { %943 = vsyncpa [#allocation5], 1 }
 0x4a2   :  { %944 = vsyncpa [#allocation8], 1 }

</bundles_post_ra>
